<compile_context>
chip_gen: v6e
topology: v6e:2x2x1
jax: 0.10.0
libtpu: 0.0.40
codegen_flags: <defaults>
</compile_context>

<pallas_src>
import jax
import jax.numpy as jnp
from jax import lax
from jax.experimental import pallas as pl
from jax.experimental.pallas import tpu as pltpu


def _round_up(x, m):
    return (x + m - 1) // m * m


def conv_bn_layer(x_nchw, weight, gamma, beta, *, stride=1, padding=1, eps=1e-5):
    N, C_in, H, W = x_nchw.shape
    C_out, C_in_w, KH, KW = weight.shape
    assert C_in_w == C_in, "groups=1 only"
    OH = (H + 2 * padding - KH) // stride + 1
    OW = (W + 2 * padding - KW) // stride + 1
    OHW = OH * OW
    C_out_pad = _round_up(C_out, 128)          # lane-dense output-channel tile
    H_pad = H + 2 * padding
    W_pad = W + 2 * padding

    # ---- glue: NHWC + spatial zero-pad, bf16 operands for the MXU ----
    x = jnp.transpose(x_nchw, (0, 2, 3, 1))
    xp = jnp.pad(x, ((0, 0), (padding, padding), (padding, padding), (0, 0)))
    xp = xp.astype(jnp.bfloat16)                                     # (N, H_pad, W_pad, C_in)

    # weight (C_out, C_in, KH, KW) -> (KH*KW, C_in, C_out_pad), zero-padded channels, bf16
    wt = jnp.transpose(weight, (2, 3, 1, 0)).reshape(KH * KW, C_in, C_out)
    wt = jnp.pad(wt, ((0, 0), (0, 0), (0, C_out_pad - C_out))).astype(jnp.bfloat16)

    # ---- kernel 1: direct conv (sum of per-tap bf16 matmuls) + per-image BN partial stats ----
    def conv_stats_kernel(x_ref, w_ref, y_ref, sum_ref, sq_ref):
        xv = x_ref[0]                                                # (H_pad, W_pad, C_in) bf16
        acc = jnp.zeros((OHW, C_out_pad), jnp.float32)
        for kh in range(KH):
            for kw in range(KW):
                win = xv[kh:kh + stride * (OH - 1) + 1:stride,
                         kw:kw + stride * (OW - 1) + 1:stride, :]    # (OH, OW, C_in)
                a = win.reshape(OHW, C_in)                           # bf16 LHS for this tap
                acc += jnp.dot(a, w_ref[kh * KW + kw],
                               preferred_element_type=jnp.float32)
        y_ref[0] = acc.astype(y_ref.dtype)                           # bf16 intermediate
        sum_ref[0] = jnp.sum(acc, axis=0, keepdims=True)             # f32 partial stats
        sq_ref[0] = jnp.sum(acc * acc, axis=0, keepdims=True)

    conv_out, psum, psq = pl.pallas_call(
        conv_stats_kernel,
        out_shape=(
            jax.ShapeDtypeStruct((N, OHW, C_out_pad), jnp.bfloat16),
            jax.ShapeDtypeStruct((N, 1, C_out_pad), jnp.float32),
            jax.ShapeDtypeStruct((N, 1, C_out_pad), jnp.float32),
        ),
        grid_spec=pltpu.PrefetchScalarGridSpec(
            num_scalar_prefetch=0,
            grid=(N,),
            in_specs=[
                pl.BlockSpec((1, H_pad, W_pad, C_in), lambda n: (n, 0, 0, 0)),
                pl.BlockSpec((KH * KW, C_in, C_out_pad), lambda n: (0, 0, 0)),
            ],
            out_specs=[
                pl.BlockSpec((1, OHW, C_out_pad), lambda n: (n, 0, 0)),
                pl.BlockSpec((1, 1, C_out_pad), lambda n: (n, 0, 0)),
                pl.BlockSpec((1, 1, C_out_pad), lambda n: (n, 0, 0)),
            ],
        ),
        compiler_params=pltpu.CompilerParams(
            dimension_semantics=("parallel",),        # partial stats -> no resident accumulator
            vmem_limit_bytes=32 * 1024 * 1024,        # explicit budget (fits v7x 64 MiB / v5e 128 MiB)
        ),
    )(xp, wt)

    # ---- glue: reduce partials, fold BN (training-mode, biased variance) into scale/shift ----
    Mtot = N * OHW
    mean = jnp.sum(psum, axis=0) / Mtot                              # (1, C_out_pad) f32
    var = jnp.maximum(jnp.sum(psq, axis=0) / Mtot - mean * mean, 0.0)
    invstd = lax.rsqrt(var + eps)
    gamma_p = jnp.pad(gamma.astype(jnp.float32), (0, C_out_pad - C_out)).reshape(1, C_out_pad)
    beta_p = jnp.pad(beta.astype(jnp.float32), (0, C_out_pad - C_out)).reshape(1, C_out_pad)
    scale = gamma_p * invstd
    shift = beta_p - mean * scale

    # ---- kernel 2: BN affine + exact GELU, transposed lane-dense write -> NCHW ----
    def bn_gelu_kernel(y_ref, scale_ref, shift_ref, o_ref):
        co = o_ref.shape[1]
        y = y_ref[0].astype(jnp.float32)                             # (OHW, C_out_pad)
        xn = y * scale_ref[...] + shift_ref[...]
        act = 0.5 * xn * (1.0 + lax.erf(xn * (2.0 ** -0.5)))         # exact GELU (nn.GELU default)
        o_ref[0] = jnp.transpose(act)[:co, :]                        # (C_out, OHW) f32

    out = pl.pallas_call(
        bn_gelu_kernel,
        out_shape=jax.ShapeDtypeStruct((N, C_out, OHW), jnp.float32),
        grid_spec=pltpu.PrefetchScalarGridSpec(
            num_scalar_prefetch=0,
            grid=(N,),
            in_specs=[
                pl.BlockSpec((1, OHW, C_out_pad), lambda n: (n, 0, 0)),
                pl.BlockSpec((1, C_out_pad), lambda n: (0, 0)),
                pl.BlockSpec((1, C_out_pad), lambda n: (0, 0)),
            ],
            out_specs=pl.BlockSpec((1, C_out, OHW), lambda n: (n, 0, 0)),
        ),
        compiler_params=pltpu.CompilerParams(
            dimension_semantics=("parallel",),
            vmem_limit_bytes=32 * 1024 * 1024,
        ),
    )(conv_out, scale, shift)

    return out.reshape(N, C_out, OH, OW)                             # already NCHW


def _reference(x_nchw, weight, gamma, beta, *, stride=1, padding=1, eps=1e-5):
    """Pure-JAX f32 reference matching the PyTorch module in training mode."""
    y = lax.conv_general_dilated(
        x_nchw.astype(jnp.float32), weight.astype(jnp.float32),
        window_strides=(stride, stride),
        padding=[(padding, padding), (padding, padding)],
        dimension_numbers=("NCHW", "OIHW", "NCHW"))
    mean = jnp.mean(y, axis=(0, 2, 3), keepdims=True)
    var = jnp.mean((y - mean) ** 2, axis=(0, 2, 3), keepdims=True)   # biased variance
    xn = (y - mean) / jnp.sqrt(var + eps)
    xn = xn * gamma.reshape(1, -1, 1, 1) + beta.reshape(1, -1, 1, 1)
    return 0.5 * xn * (1.0 + lax.erf(xn * (2.0 ** -0.5)))            # exact GELU


if __name__ == "__main__":
    key = jax.random.PRNGKey(0)
    N, C_in, H, W = 2, 4, 16, 16
    C_out, KH, KW = 8, 3, 3
    stride, padding = 1, 1

    kx, kw = jax.random.split(key)
    x = jax.random.normal(kx, (N, C_in, H, W), jnp.float32)

    # kaiming_uniform_(a=0, mode='fan_in', nonlinearity='relu'): U(-b, b), b = sqrt(6 / fan_in)
    fan_in = C_in * KH * KW
    bound = (6.0 / fan_in) ** 0.5
    weight = jax.random.uniform(kw, (C_out, C_in, KH, KW), jnp.float32, -bound, bound)
    gamma = jnp.ones((C_out,), jnp.float32)   # BatchNorm2d default weight
    beta = jnp.zeros((C_out,), jnp.float32)   # BatchNorm2d default bias

    y = conv_bn_layer(x, weight, gamma, beta, stride=stride, padding=padding)
    y = jax.block_until_ready(y)

    y_ref = _reference(x, weight, gamma, beta, stride=stride, padding=padding)
    assert y.shape == (N, C_out, H, W)
    # bf16 MXU operands + bf16 conv->BN intermediate (f32 stats/accumulation): relaxed tolerance.
    assert jnp.allclose(y, y_ref, rtol=3e-2, atol=3e-2), "mismatch vs reference"
    print("KERNEL_OK")
</pallas_src>

<mosaic_0001>
module attributes {stable_mosaic.version = 11 : i64} {
  func.func @conv_stats_kernel(%arg0: i32, %arg1: memref<1x18x18x4xbf16, #tpu.memory_space<vmem>>, %arg2: memref<9x4x128xbf16, #tpu.memory_space<vmem>>, %arg3: memref<1x256x128xbf16, #tpu.memory_space<vmem>>, %arg4: memref<1x1x128xf32, #tpu.memory_space<vmem>>, %arg5: memref<1x1x128xf32, #tpu.memory_space<vmem>>) attributes {dimension_semantics = [#tpu.dimension_semantics<parallel>], iteration_bounds = array<i64: 2>, scalar_prefetch = 0 : i64, scratch_operands = 0 : i64, tpu.core_type = #tpu.core_type<tc>, window_params = [{transform_indices = @transform_0, window_bounds = array<i64: 1, 18, 18, 4>}, {pipeline_mode = #tpu.pipeline_mode<synchronous>, transform_indices = @transform_1, window_bounds = array<i64: 9, 4, 128>}, {transform_indices = @transform_2, window_bounds = array<i64: 1, 256, 128>}, {transform_indices = @transform_3, window_bounds = array<i64: 1, 1, 128>}, {transform_indices = @transform_4, window_bounds = array<i64: 1, 1, 128>}]} {
    %c0 = arith.constant 0 : index
    %c0_0 = arith.constant 0 : index
    %c0_1 = arith.constant 0 : index
    %c0_2 = arith.constant 0 : index
    %0 = vector.load %arg1[%c0, %c0_0, %c0_1, %c0_2] : memref<1x18x18x4xbf16, #tpu.memory_space<vmem>>, vector<1x18x18x4xbf16>
    %1 = vector.shape_cast %0 : vector<1x18x18x4xbf16> to vector<18x18x4xbf16>
    %cst = arith.constant 0.000000e+00 : f32
    %2 = vector.broadcast %cst : f32 to vector<256x128xf32>
    %3 = vector.extract_strided_slice %1 {offsets = [0, 0, 0], sizes = [16, 16, 4], strides = [1, 1, 1]} : vector<18x18x4xbf16> to vector<16x16x4xbf16>
    %4 = vector.shape_cast %3 : vector<16x16x4xbf16> to vector<256x4xbf16>
    %c0_3 = arith.constant 0 : index
    %c0_4 = arith.constant 0 : index
    %c0_5 = arith.constant 0 : index
    %5 = vector.load %arg2[%c0_3, %c0_4, %c0_5] : memref<9x4x128xbf16, #tpu.memory_space<vmem>>, vector<1x4x128xbf16>
    %6 = vector.shape_cast %5 : vector<1x4x128xbf16> to vector<4x128xbf16>
    %cst_6 = arith.constant dense<0.000000e+00> : vector<256x128xf32>
    %7 = tpu.matmul %4, %6, %cst_6 {dimension_numbers = #tpu.dot_dimension_numbers<[1], [0], [0], [1], [0, 0, 1, 1], [], []>} : vector<256x4xbf16>, vector<4x128xbf16>, vector<256x128xf32> -> vector<256x128xf32>
    %8 = arith.addf %2, %7 : vector<256x128xf32>
    %9 = vector.extract_strided_slice %1 {offsets = [0, 1, 0], sizes = [16, 16, 4], strides = [1, 1, 1]} : vector<18x18x4xbf16> to vector<16x16x4xbf16>
    %10 = vector.shape_cast %9 : vector<16x16x4xbf16> to vector<256x4xbf16>
    %c1 = arith.constant 1 : index
    %c0_7 = arith.constant 0 : index
    %c0_8 = arith.constant 0 : index
    %11 = vector.load %arg2[%c1, %c0_7, %c0_8] : memref<9x4x128xbf16, #tpu.memory_space<vmem>>, vector<1x4x128xbf16>
    %12 = vector.shape_cast %11 : vector<1x4x128xbf16> to vector<4x128xbf16>
    %cst_9 = arith.constant dense<0.000000e+00> : vector<256x128xf32>
    %13 = tpu.matmul %10, %12, %cst_9 {dimension_numbers = #tpu.dot_dimension_numbers<[1], [0], [0], [1], [0, 0, 1, 1], [], []>} : vector<256x4xbf16>, vector<4x128xbf16>, vector<256x128xf32> -> vector<256x128xf32>
    %14 = arith.addf %8, %13 : vector<256x128xf32>
    %15 = vector.extract_strided_slice %1 {offsets = [0, 2, 0], sizes = [16, 16, 4], strides = [1, 1, 1]} : vector<18x18x4xbf16> to vector<16x16x4xbf16>
    %16 = vector.shape_cast %15 : vector<16x16x4xbf16> to vector<256x4xbf16>
    %c2 = arith.constant 2 : index
    %c0_10 = arith.constant 0 : index
    %c0_11 = arith.constant 0 : index
    %17 = vector.load %arg2[%c2, %c0_10, %c0_11] : memref<9x4x128xbf16, #tpu.memory_space<vmem>>, vector<1x4x128xbf16>
    %18 = vector.shape_cast %17 : vector<1x4x128xbf16> to vector<4x128xbf16>
    %cst_12 = arith.constant dense<0.000000e+00> : vector<256x128xf32>
    %19 = tpu.matmul %16, %18, %cst_12 {dimension_numbers = #tpu.dot_dimension_numbers<[1], [0], [0], [1], [0, 0, 1, 1], [], []>} : vector<256x4xbf16>, vector<4x128xbf16>, vector<256x128xf32> -> vector<256x128xf32>
    %20 = arith.addf %14, %19 : vector<256x128xf32>
    %21 = vector.extract_strided_slice %1 {offsets = [1, 0, 0], sizes = [16, 16, 4], strides = [1, 1, 1]} : vector<18x18x4xbf16> to vector<16x16x4xbf16>
    %22 = vector.shape_cast %21 : vector<16x16x4xbf16> to vector<256x4xbf16>
    %c3 = arith.constant 3 : index
    %c0_13 = arith.constant 0 : index
    %c0_14 = arith.constant 0 : index
    %23 = vector.load %arg2[%c3, %c0_13, %c0_14] : memref<9x4x128xbf16, #tpu.memory_space<vmem>>, vector<1x4x128xbf16>
    %24 = vector.shape_cast %23 : vector<1x4x128xbf16> to vector<4x128xbf16>
    %cst_15 = arith.constant dense<0.000000e+00> : vector<256x128xf32>
    %25 = tpu.matmul %22, %24, %cst_15 {dimension_numbers = #tpu.dot_dimension_numbers<[1], [0], [0], [1], [0, 0, 1, 1], [], []>} : vector<256x4xbf16>, vector<4x128xbf16>, vector<256x128xf32> -> vector<256x128xf32>
    %26 = arith.addf %20, %25 : vector<256x128xf32>
    %27 = vector.extract_strided_slice %1 {offsets = [1, 1, 0], sizes = [16, 16, 4], strides = [1, 1, 1]} : vector<18x18x4xbf16> to vector<16x16x4xbf16>
    %28 = vector.shape_cast %27 : vector<16x16x4xbf16> to vector<256x4xbf16>
    %c4 = arith.constant 4 : index
    %c0_16 = arith.constant 0 : index
    %c0_17 = arith.constant 0 : index
    %29 = vector.load %arg2[%c4, %c0_16, %c0_17] : memref<9x4x128xbf16, #tpu.memory_space<vmem>>, vector<1x4x128xbf16>
    %30 = vector.shape_cast %29 : vector<1x4x128xbf16> to vector<4x128xbf16>
    %cst_18 = arith.constant dense<0.000000e+00> : vector<256x128xf32>
    %31 = tpu.matmul %28, %30, %cst_18 {dimension_numbers = #tpu.dot_dimension_numbers<[1], [0], [0], [1], [0, 0, 1, 1], [], []>} : vector<256x4xbf16>, vector<4x128xbf16>, vector<256x128xf32> -> vector<256x128xf32>
    %32 = arith.addf %26, %31 : vector<256x128xf32>
    %33 = vector.extract_strided_slice %1 {offsets = [1, 2, 0], sizes = [16, 16, 4], strides = [1, 1, 1]} : vector<18x18x4xbf16> to vector<16x16x4xbf16>
    %34 = vector.shape_cast %33 : vector<16x16x4xbf16> to vector<256x4xbf16>
    %c5 = arith.constant 5 : index
    %c0_19 = arith.constant 0 : index
    %c0_20 = arith.constant 0 : index
    %35 = vector.load %arg2[%c5, %c0_19, %c0_20] : memref<9x4x128xbf16, #tpu.memory_space<vmem>>, vector<1x4x128xbf16>
    %36 = vector.shape_cast %35 : vector<1x4x128xbf16> to vector<4x128xbf16>
    %cst_21 = arith.constant dense<0.000000e+00> : vector<256x128xf32>
    %37 = tpu.matmul %34, %36, %cst_21 {dimension_numbers = #tpu.dot_dimension_numbers<[1], [0], [0], [1], [0, 0, 1, 1], [], []>} : vector<256x4xbf16>, vector<4x128xbf16>, vector<256x128xf32> -> vector<256x128xf32>
    %38 = arith.addf %32, %37 : vector<256x128xf32>
    %39 = vector.extract_strided_slice %1 {offsets = [2, 0, 0], sizes = [16, 16, 4], strides = [1, 1, 1]} : vector<18x18x4xbf16> to vector<16x16x4xbf16>
    %40 = vector.shape_cast %39 : vector<16x16x4xbf16> to vector<256x4xbf16>
    %c6 = arith.constant 6 : index
    %c0_22 = arith.constant 0 : index
    %c0_23 = arith.constant 0 : index
    %41 = vector.load %arg2[%c6, %c0_22, %c0_23] : memref<9x4x128xbf16, #tpu.memory_space<vmem>>, vector<1x4x128xbf16>
    %42 = vector.shape_cast %41 : vector<1x4x128xbf16> to vector<4x128xbf16>
    %cst_24 = arith.constant dense<0.000000e+00> : vector<256x128xf32>
    %43 = tpu.matmul %40, %42, %cst_24 {dimension_numbers = #tpu.dot_dimension_numbers<[1], [0], [0], [1], [0, 0, 1, 1], [], []>} : vector<256x4xbf16>, vector<4x128xbf16>, vector<256x128xf32> -> vector<256x128xf32>
    %44 = arith.addf %38, %43 : vector<256x128xf32>
    %45 = vector.extract_strided_slice %1 {offsets = [2, 1, 0], sizes = [16, 16, 4], strides = [1, 1, 1]} : vector<18x18x4xbf16> to vector<16x16x4xbf16>
    %46 = vector.shape_cast %45 : vector<16x16x4xbf16> to vector<256x4xbf16>
    %c7 = arith.constant 7 : index
    %c0_25 = arith.constant 0 : index
    %c0_26 = arith.constant 0 : index
    %47 = vector.load %arg2[%c7, %c0_25, %c0_26] : memref<9x4x128xbf16, #tpu.memory_space<vmem>>, vector<1x4x128xbf16>
    %48 = vector.shape_cast %47 : vector<1x4x128xbf16> to vector<4x128xbf16>
    %cst_27 = arith.constant dense<0.000000e+00> : vector<256x128xf32>
    %49 = tpu.matmul %46, %48, %cst_27 {dimension_numbers = #tpu.dot_dimension_numbers<[1], [0], [0], [1], [0, 0, 1, 1], [], []>} : vector<256x4xbf16>, vector<4x128xbf16>, vector<256x128xf32> -> vector<256x128xf32>
    %50 = arith.addf %44, %49 : vector<256x128xf32>
    %51 = vector.extract_strided_slice %1 {offsets = [2, 2, 0], sizes = [16, 16, 4], strides = [1, 1, 1]} : vector<18x18x4xbf16> to vector<16x16x4xbf16>
    %52 = vector.shape_cast %51 : vector<16x16x4xbf16> to vector<256x4xbf16>
    %c8 = arith.constant 8 : index
    %c0_28 = arith.constant 0 : index
    %c0_29 = arith.constant 0 : index
    %53 = vector.load %arg2[%c8, %c0_28, %c0_29] : memref<9x4x128xbf16, #tpu.memory_space<vmem>>, vector<1x4x128xbf16>
    %54 = vector.shape_cast %53 : vector<1x4x128xbf16> to vector<4x128xbf16>
    %cst_30 = arith.constant dense<0.000000e+00> : vector<256x128xf32>
    %55 = tpu.matmul %52, %54, %cst_30 {dimension_numbers = #tpu.dot_dimension_numbers<[1], [0], [0], [1], [0, 0, 1, 1], [], []>} : vector<256x4xbf16>, vector<4x128xbf16>, vector<256x128xf32> -> vector<256x128xf32>
    %56 = arith.addf %50, %55 : vector<256x128xf32>
    %57 = arith.truncf %56 : vector<256x128xf32> to vector<256x128xbf16>
    %c0_31 = arith.constant 0 : index
    %c0_32 = arith.constant 0 : index
    %c0_33 = arith.constant 0 : index
    %58 = vector.load %arg3[%c0_31, %c0_32, %c0_33] : memref<1x256x128xbf16, #tpu.memory_space<vmem>>, vector<1x256x128xbf16>
    %59 = vector.shape_cast %58 : vector<1x256x128xbf16> to vector<256x128xbf16>
    %60 = vector.shape_cast %57 : vector<256x128xbf16> to vector<1x256x128xbf16>
    tpu.vector_store %arg3[%c0_31, %c0_32, %c0_33], %60 {strides = array<i32>} : memref<1x256x128xbf16, #tpu.memory_space<vmem>>, vector<1x256x128xbf16>,
    %cst_34 = arith.constant dense<0.000000e+00> : vector<128xf32>
    %61 = vector.multi_reduction <add>, %56, %cst_34 [0] : vector<256x128xf32> to vector<128xf32>
    %62 = vector.shape_cast %61 : vector<128xf32> to vector<1x128xf32>
    %c0_35 = arith.constant 0 : index
    %c0_36 = arith.constant 0 : index
    %c0_37 = arith.constant 0 : index
    %63 = vector.load %arg4[%c0_35, %c0_36, %c0_37] : memref<1x1x128xf32, #tpu.memory_space<vmem>>, vector<1x1x128xf32>
    %64 = vector.shape_cast %63 : vector<1x1x128xf32> to vector<1x128xf32>
    %65 = vector.shape_cast %62 : vector<1x128xf32> to vector<1x1x128xf32>
    tpu.vector_store %arg4[%c0_35, %c0_36, %c0_37], %65 {strides = array<i32>} : memref<1x1x128xf32, #tpu.memory_space<vmem>>, vector<1x1x128xf32>,
    %66 = arith.mulf %56, %56 : vector<256x128xf32>
    %cst_38 = arith.constant dense<0.000000e+00> : vector<128xf32>
    %67 = vector.multi_reduction <add>, %66, %cst_38 [0] : vector<256x128xf32> to vector<128xf32>
    %68 = vector.shape_cast %67 : vector<128xf32> to vector<1x128xf32>
    %c0_39 = arith.constant 0 : index
    %c0_40 = arith.constant 0 : index
    %c0_41 = arith.constant 0 : index
    %69 = vector.load %arg5[%c0_39, %c0_40, %c0_41] : memref<1x1x128xf32, #tpu.memory_space<vmem>>, vector<1x1x128xf32>
    %70 = vector.shape_cast %69 : vector<1x1x128xf32> to vector<1x128xf32>
    %71 = vector.shape_cast %68 : vector<1x128xf32> to vector<1x1x128xf32>
    tpu.vector_store %arg5[%c0_39, %c0_40, %c0_41], %71 {strides = array<i32>} : memref<1x1x128xf32, #tpu.memory_space<vmem>>, vector<1x1x128xf32>,
    return
  }
  func.func @transform_0(%arg0: i32) -> (i32, i32, i32, i32) {
    %c0_i32 = arith.constant 0 : i32
    %c0_i32_0 = arith.constant 0 : i32
    %c0_i32_1 = arith.constant 0 : i32
    %c0_i32_2 = arith.constant 0 : i32
    return %arg0, %c0_i32, %c0_i32_0, %c0_i32_1 : i32, i32, i32, i32
  }
  func.func @transform_1(%arg0: i32) -> (i32, i32, i32) {
    %c0_i32 = arith.constant 0 : i32
    %c0_i32_0 = arith.constant 0 : i32
    %c0_i32_1 = arith.constant 0 : i32
    %c0_i32_2 = arith.constant 0 : i32
    return %c0_i32, %c0_i32_0, %c0_i32_1 : i32, i32, i32
  }
  func.func @transform_2(%arg0: i32) -> (i32, i32, i32) {
    %c0_i32 = arith.constant 0 : i32
    %c0_i32_0 = arith.constant 0 : i32
    %c0_i32_1 = arith.constant 0 : i32
    return %arg0, %c0_i32, %c0_i32_0 : i32, i32, i32
  }
  func.func @transform_3(%arg0: i32) -> (i32, i32, i32) {
    %c0_i32 = arith.constant 0 : i32
    %c0_i32_0 = arith.constant 0 : i32
    %c0_i32_1 = arith.constant 0 : i32
    return %arg0, %c0_i32, %c0_i32_0 : i32, i32, i32
  }
  func.func @transform_4(%arg0: i32) -> (i32, i32, i32) {
    %c0_i32 = arith.constant 0 : i32
    %c0_i32_0 = arith.constant 0 : i32
    %c0_i32_1 = arith.constant 0 : i32
    return %arg0, %c0_i32, %c0_i32_0 : i32, i32, i32
  }
}

</mosaic_0001>

<bundles_post_ra>
// kernel: tpu_custom_call.1
= control target key start
LH: loop header
LB: loop body
LE: loop exit
PB: predicated region body
PF: predicated region fallthrough
CT: control target
= control target key end

     0   :  { %10 = vsyncpa [#allocation3], 0  ;;  %s6037_s0 = inlined_call_operand.vmem [shape: bf16[2,18,18,4], index: 0, kind: input, shape index: {}]   ;;  %s6038_s1 = inlined_call_operand.vmem [shape: bf16[9,4,128], index: 1, kind: input, shape index: {}]   ;;  %s6039_s2 = inlined_call_operand.hbm [shape: bf16[2,256,128], index: 2, kind: output, shape index: {0}]   ;;  %s6040_s3 = inlined_call_operand.hbm [shape: f32[2,1,128], index: 3, kind: output, shape index: {1}]   ;;  %s6041_s4 = inlined_call_operand.hbm [shape: f32[2,1,128], index: 4, kind: output, shape index: {2}]  }
   0x1   :  { %12 = vsyncpa [#allocation3 + $0x1], 0 }
   0x2   :  { %13 = vsyncpa [#allocation5], 0 }
   0x3   :  { %15 = vsyncpa [#allocation5 + $0x1], 0  ;;  %s4445_s15 = smov 0   ;;  %s4447_s16 = smov 0  }
   0x4   :  { %s4449_s17 = smov 0   ;;  %s4451_s18 = smov 0  }
   0x5 LB: > { %s4466_s19 = sadd.s32 4294967295, %s4413_s18   ;;  %s3359_s20 = sadd.s32 4294967294, %s4413_s18   ;;  %s4413_s18 = sphi %s4451_s18, %s6223_s18   ;;  %s4409_s17 = sphi %s4449_s17, %s6222_s17   ;;  %s4405_s16 = sphi %s4447_s16, %s6221_s16   ;;  %s4401_s15 = sphi %s4445_s15, %s6220_s15  }
   0x6   : > { %s4470_s21 = sadd.s32 1, %s4413_s18   ;;  %s75_s22 = sadd.s32 1, %s4409_s17 }
   0x7   : > { %s72_s23 = ssub.s32 %s4413_s18, %s4470_s21  ;;  %p85_p0 = scmp.ne.s32.totalorder %s4409_s17, %s4405_s16 }
   0x8   : > { %p73_p1 = scmp.eq.s32.totalorder %s72_s23, 0  ;;  %p86_p2 = scmp.eq.s32.totalorder %s4466_s19, 1 }
   0x9   : > { %p91_p3 = scmp.ne.s32.totalorder %s4405_s16, %s4401_s15  ;;  %p92_p4 = scmp.eq.s32.totalorder %s3359_s20, 1 }
   0xa   : > { %s4483_s24 = scalar_select %p73_p1, %s4409_s17, %s75_s22  }
   0xb   : > { %p4485_p5 = por %p86_p2, %p85_p0  ;;  %p4489_p6 = por %p92_p4, %p91_p3 }
   0xc   : > { %p3362_p7 = scmp.ge.s32.totalorder %s4413_s18, 1  ;;  %p173_p8 = scmp.lt.s32.totalorder %s4413_s18, 3 }
   0xe   : > { %p174_p9 = pnand %p3362_p7, %p173_p8 }
  0x10   : > { %177 = sbr.rel (%p174_p9) target bundleno = 626 (0x272), region = 28 }
  0x15   : > { %v3365_v0 = vld [vmem:[%s6038_s1 + $0x2] sm:$0x3]  ;;  %vm754_vm0 = vcmask 1041408   ;;  %p207_p10 = scmp.lt.s32.totalorder %s4466_s19, 1  ;;  %v267_v2 = vld [vmem:[%s6038_s1] sm:$0x3] }
  0x16   : > { %4218 = vmatprep.subr.msk.bf16.mxu1 %vm754_vm0, %v3365_v0  ;;  %4217 = vmatprep.subr.msk.bf16.mxu0 %vm754_vm0, %v3365_v0  ;;  %v756_v1 = vsel %vm754_vm0, %v3365_v0, 0  ;;  %v3446_v3 = vld [vmem:[%s6038_s1 + $0x4] sm:$0x3]  ;;  %vm268_vm1 = vsmask.f32 3328  ;;  %v4517_v4 = vsel %vm754_vm0, %v267_v2, 0 }
  0x17   : > { %4216 = vmatpush3.bf16.msra.mxu1 %v756_v1  ;;  %3910 = vmatpush3.bf16.msra.mxu0 %v756_v1  ;;  %s208_s5 = scalar_select %p207_p10, %s4466_s19, 1  ;;  %vm269_vm2 = vsmask.f32 7440  ;;  %v4520_v5 = vsel %vm754_vm0, %v3446_v3, 0  ;;  %vm705_vm3 = vcmask 31744   ;;  %v6087_v32 = vmov 0 }
  0x18   : > { %4219 = vmatprep.subr.msk.bf16.mxu1 %vm754_vm0, %v267_v2  ;;  %4220 = vmatprep.subr.msk.bf16.mxu0 %vm754_vm0, %v3446_v3  ;;  %vm4559_vm4 = vmor %vm268_vm1, %vm269_vm2  ;;  %vm1227_vm5 = vcmask 1042432   ;;  %vm1228_vm6 = vcmask 1046532   ;;  %s4415_s28 = smov [#allocation2]  }
  0x19   : > { %s4227_s8 = smul.u32 216, %s208_s5  ;;  %v6088_v32 = vsel %vm4559_vm4, 4294967295, %v6087_v32  ;;  %vm4882_vm7 = vmor %vm1227_vm5, %vm1228_vm6  ;;  %s4301_s29 = sshll.u32 %s4415_s28, 4  ;;  %s4302_s29 = int_to_ptr.vmem [resolvable:$false] %s4301_s29 }
  0x1a   : > { %6089 = vst [vmem:[#allocation9_spill] sm:$0xff] %v6088_v32  ;;  %s4303_s30 = scalar_lea.vmem %s4302_s29, 4096 }
  0x1b   : > { %s4514_s11 = scalar_lea.vmem %s6037_s0, %s4227_s8  ;;  %s5825_s8 = sand.u32 1, %s4405_s16  }
  0x1c   : > { %v4523_v6 = vld [vmem:[%s4514_s11] sm:$0xf]  ;;  %v4526_v7 = vld [vmem:[%s4514_s11 + $0x4] sm:$0xf]  ;;  %v4529_v8 = vld [vmem:[%s4514_s11 + $0x8] sm:$0x1] }
  0x1d   : > { %v272_v9 = vshrl.u32 %v4523_v6, 16  ;;  %v275_v10 = vshll.u32 %v4523_v6, 16  ;;  %v281_v11 = vshll.u32 %v4526_v7, 16  ;;  %v285_v12 = vshrl.u32 %v4526_v7, 16  ;;  %v4536_v13 = vld [vmem:[%s4514_s11 + $0x60] sm:$0xf] }
  0x1e   : > { %v291_v14 = vshll.u32 %v4529_v8, 16  ;;  %v4541_v16 = vld [vmem:[%s4514_s11 + $0x64] sm:$0xf]  ;;  %v4544_v17 = vld [vmem:[%s4514_s11 + $0x68] sm:$0x1]  ;;  %v464_v23 = vshrl.u32 %v4536_v13, 16 }
  0x1f   : > { %v274_v18 = vrot.slane %v272_v9, 4  ;;  %v277_v19 = vrot.slane %v275_v10, 5  ;;  %v283_v20 = vrot.slane %v281_v11, 5  ;;  %v287_v21 = vrot.slane %v285_v12, 4  ;;  %v4552_v30 = vld [vmem:[%s4514_s11 + $0xc] sm:$0xf] }
  0x20   : > { %v293_v22 = vrot.slane %v291_v14, 5  ;;  %v467_v24 = vshll.u32 %v4536_v13, 16  ;;  %v473_v25 = vshll.u32 %v4541_v16, 16  ;;  %v477_v28 = vshrl.u32 %v4541_v16, 16  ;;  %v4555_v31 = vld [vmem:[%s4514_s11 + $0x10] sm:$0xf] }
  0x21   : > { %v278_v26 = vor.u32 %v277_v19, %v274_v18  ;;  %v288_v27 = vor.u32 %v287_v21, %v283_v20  ;;  %v483_v29 = vshll.u32 %v4544_v17, 16  ;;  %v466_v33 = vrot.slane %v464_v23, 4  ;;  %v4566_v42 = vld [vmem:[%s4514_s11 + $0x14] sm:$0x1]  ;;  %v4577_v54 = vld [vmem:[%s4514_s11 + $0x6c] sm:$0xf] }
  0x22   : > { %v469_v34 = vrot.slane %v467_v24, 5  ;;  %v475_v35 = vrot.slane %v473_v25, 5  ;;  %v479_v39 = vrot.slane %v477_v28, 4  ;;  %v296_v43 = vshrl.u32 %v4552_v30, 16  ;;  %6090 = vst [vmem:[#allocation10_spill] sm:$0xff] %v4577_v54  ;;  %s3363_s9 = sshll.u32 %s5825_s8, 7 }
  0x23   : > { %v279_v37 = vrot.slane %v278_v26, 4  ;;  %v289_v38 = vrot.slane %v288_v27, 4  ;;  %v485_v40 = vrot.slane %v483_v29, 5  ;;  %v299_v44 = vshll.u32 %v4552_v30, 16  ;;  %v4581_v59 = vld [vmem:[%s4514_s11 + $0x70] sm:$0xf] }
  0x24   : > { %v470_v41 = vor.u32 %v469_v34, %v466_v33  ;;  %v305_v45 = vshll.u32 %v4555_v31, 16  ;;  %v480_v48 = vor.u32 %v479_v39, %v475_v35  ;;  %v309_v49 = vshrl.u32 %v4555_v31, 16  ;;  %v4589_v0 = vld [vmem:[%s4514_s11 + $0x74] sm:$0x1]  ;;  %v4595_v10 = vld [vmem:[%s4514_s11 + $0x18] sm:$0xf] }
  0x25   : > { %v284_v46 = vsel %vm4559_vm4, %v279_v37, %v283_v20  ;;  %v294_v47 = vsel %vm4559_vm4, %v289_v38, %v293_v22  ;;  %v298_v52 = vrot.slane %v296_v43, 4  ;;  %v301_v53 = vrot.slane %v299_v44, 5  ;;  %6091 = vst [vmem:[#allocation11_spill] sm:$0xff] %v4589_v0  ;;  %v4604_v23 = vld [vmem:[%s4514_s11 + $0x1c] sm:$0xf]  ;;  %s5841_s10 = scalar_lea.vmem [#allocation2], %s3363_s9 }
  0x26   : > { %v3366_v50 = vcombine.low %v284_v46, %v294_v47  ;;  %v471_v51 = vrot.slane %v470_v41, 4  ;;  %v481_v55 = vrot.slane %v480_v48, 4  ;;  %v307_v56 = vrot.slane %v305_v45, 5  ;;  %v4611_v27 = vld [vmem:[%s4514_s11 + $0x20] sm:$0x1]  ;;  %s3218_s12 = sshll.u32 %s5841_s10, 4  ;;  %s5925_s12 = int_to_ptr.vmem [resolvable:$true] %s3218_s12 }
  0x27   : > { %v311_v57 = vrot.slane %v309_v49, 4  ;;  %v315_v58 = vshll.u32 %v4566_v42, 16  ;;  %v302_v61 = vor.u32 %v301_v53, %v298_v52  ;;  %v488_v9 = vshrl.u32 %v4577_v54, 16  ;;  %v4618_v37 = vld [vmem:[%s4514_s11 + $0x78] sm:$0xf]  ;;  %s3197_s23 = scalar_lea.sflag [#allocation3], %s5825_s8  ;;  %p4304_p0 = scmp.lt.s32.totalorder %s5925_s12, %s4302_s29 }
  0x28   : > { %3911 = vmatprep.mubr.msk.bf16.mxu0 %vm705_vm3, %v3366_v50  ;;  %v476_v60 = vsel %vm4559_vm4, %v471_v51, %v475_v35  ;;  %v486_v1 = vsel %vm4559_vm4, %v481_v55, %v485_v40  ;;  %v491_v14 = vshll.u32 %v4577_v54, 16  ;;  %v497_v18 = vshll.u32 %v4581_v59, 16  ;;  %6093 = vst [vmem:[#allocation13_spill] sm:$0xff] %v4618_v37  ;;  %v4626_v43 = vld [vmem:[%s6038_s1 + $0x8] sm:$0x3]  ;;  %s4297_s27 = scalar_lea.vmem %s5925_s12, 2048 }
  0x29   : > { %v312_v2 = vor.u32 %v311_v57, %v307_v56  ;;  %v317_v3 = vrot.slane %v315_v58, 5  ;;  %v4597_v11 = vcombine.low %v476_v60, %v486_v1  ;;  %v303_v12 = vrot.slane %v302_v61, 4  ;;  %v4631_v48 = vld [vmem:[%s4514_s11 + $0x7c] sm:$0xf]  ;;  %v4639_v58 = vld [vmem:[%s4514_s11 + $0x80] sm:$0x1]  ;;  %p4298_p11 = scmp.ne.s32.totalorder %s5925_s12, %s4297_s27  ;;  %p4305_p1 = scmp.lt.s32.totalorder %s4303_s30, %s4297_s27 }
  0x2a   : > { %v490_v20 = vrot.slane %v488_v9, 4  ;;  %v501_v21 = vshrl.u32 %v4581_v59, 16  ;;  %v507_v22 = vshll.u32 %v4589_v0, 16  ;;  %v493_v25 = vrot.slane %v491_v14, 5  ;;  %6095 = vst [vmem:[#allocation15_spill] sm:$0xff] %v4631_v48  ;;  %6096 = vst [vmem:[#allocation16_spill] sm:$0xff] %v4639_v58 }
  0x2b   : > { %6092 = vst [vmem:[#allocation12_spill] sm:$0xff] %v4597_v11  ;;  %v313_v19 = vrot.slane %v312_v2, 4  ;;  %3927 = vmatprep.mubr.msk.bf16.mxu1 %vm705_vm3, %v4597_v11  ;;  %v308_v24 = vsel %vm4559_vm4, %v303_v12, %v307_v56  ;;  %v499_v26 = vrot.slane %v497_v18, 5  ;;  %v320_v28 = vshrl.u32 %v4595_v10, 16  ;;  %v4653_v18 = vld [vmem:[%s4514_s11 + $0x28] sm:$0xf]  ;;  %p4299_p12 = pnand %p4298_p11, %p4485_p5  ;;  %p4306_p2 = por %p4305_p1, %p4304_p0 }
  0x2c   : > { %v503_v33 = vrot.slane %v501_v21, 4  ;;  %v509_v34 = vrot.slane %v507_v22, 5  ;;  %v323_v35 = vshll.u32 %v4595_v10, 16  ;;  %v494_v39 = vor.u32 %v493_v25, %v490_v20 }
  0x2d   : > { %v318_v29 = vsel %vm4559_vm4, %v313_v19, %v317_v3  ;;  %v322_v40 = vrot.slane %v320_v28, 4  ;;  %v329_v41 = vshll.u32 %v4604_v23, 16  ;;  %v333_v46 = vshrl.u32 %v4604_v23, 16  ;;  %v4645_v3 = vld [vmem:[%s4514_s11 + $0x24] sm:$0xf]  ;;  %p4300_p13 = pneg %p4299_p12 }
  0x2e   : > { %v4620_v38 = vcombine.low %v308_v24, %v318_v29  ;;  %v504_v44 = vor.u32 %v503_v33, %v499_v26  ;;  %v325_v45 = vrot.slane %v323_v35, 5  ;;  %v339_v47 = vshll.u32 %v4611_v27, 16  ;;  %v4661_v24 = vld [vmem:[%s6038_s1 + $0x6] sm:$0x3]  ;;  %v4666_v29 = vld [vmem:[%s4514_s11 + $0x2c] sm:$0x1] }
  0x2f   : > { %v495_v49 = vrot.slane %v494_v39, 4  ;;  %v331_v50 = vrot.slane %v329_v41, 5  ;;  %v512_v51 = vshrl.u32 %v4618_v37, 16  ;;  %v515_v52 = vshll.u32 %v4618_v37, 16  ;;  %v4674_v41 = vld [vmem:[%s4514_s11 + $0x84] sm:$0xf]  ;;  %p4307_p3 = pnand %p4306_p2, %p4300_p13 }
  0x30   : > { %6094 = vst [vmem:[#allocation14_spill] sm:$0xff] %v4620_v38  ;;  %3912 = vmatmul.mubr.msk.bf16.vlgmr.msra.gmra.mxu0 %vm705_vm3, %v4620_v38  ;;  %v505_v53 = vrot.slane %v504_v44, 4  ;;  %v326_v55 = vor.u32 %v325_v45, %v322_v40  ;;  %v335_v56 = vrot.slane %v333_v46, 4  ;;  %v341_v57 = vrot.slane %v339_v47, 5  ;;  %v4821_v38 = vld [vmem:[%s4514_s11 + $0xb0] sm:$0x1] }
  0x31   : > { %3978 = vmatpush3.bf16.msra.mxu0 %v4520_v5  ;;  %v500_v60 = vsel %vm4559_vm4, %v495_v49, %v499_v26  ;;  %v514_v61 = vrot.slane %v512_v51, 4  ;;  %v517_v1 = vrot.slane %v515_v52, 5  ;;  %v521_v2 = vshll.u32 %v4631_v48, 16  ;;  %v4681_v49 = vld [vmem:[%s4514_s11 + $0x88] sm:$0xf]  ;;  %6108 = vst [vmem:[#allocation28_spill] sm:$0xff] %v4821_v38 }
  0x32   : > { %4222 = vmatprep.subr.msk.bf16.mxu0 %vm754_vm0, %v4626_v43  ;;  %v510_v5 = vsel %vm4559_vm4, %v505_v53, %v509_v34  ;;  %v327_v9 = vrot.slane %v326_v55, 4  ;;  %v336_v12 = vor.u32 %v335_v56, %v331_v50  ;;  %v525_v14 = vshrl.u32 %v4631_v48, 16  ;;  %v4843_v48 = vld [vmem:[%s4514_s11 + $0x5c] sm:$0x1] }
  0x33   : > { %v4655_v19 = vcombine.low %v500_v60, %v510_v5  ;;  %v518_v20 = vor.u32 %v517_v1, %v514_v61  ;;  %v523_v21 = vrot.slane %v521_v2, 5  ;;  %v531_v22 = vshll.u32 %v4639_v58, 16 }
  0x34   : > { %v332_v25 = vsel %vm4559_vm4, %v327_v9, %v331_v50  ;;  %v337_v26 = vrot.slane %v336_v12, 4  ;;  %v527_v28 = vrot.slane %v525_v14, 4  ;;  %v344_v33 = vshrl.u32 %v4645_v3, 16  ;;  %v4700_v9 = vld [vmem:[%s4514_s11 + $0x30] sm:$0xf] }
  0x35   : > { %6097 = vst [vmem:[#allocation17_spill] sm:$0xff] %v4655_v19  ;;  %3928 = vmatmul.mubr.msk.bf16.vlgmr.msra.gmra.mxu1 %vm705_vm3, %v4655_v19  ;;  %v519_v34 = vrot.slane %v518_v20, 4  ;;  %v533_v35 = vrot.slane %v531_v22, 5  ;;  %v347_v39 = vshll.u32 %v4645_v3, 16  ;;  %v353_v40 = vshll.u32 %v4653_v18, 16 }
  0x36   : > { %3944 = vmatpush3.bf16.msra.mxu1 %v4517_v4  ;;  %v342_v44 = vsel %vm4559_vm4, %v337_v26, %v341_v57  ;;  %v528_v45 = vor.u32 %v527_v28, %v523_v21  ;;  %v346_v46 = vrot.slane %v344_v33, 4  ;;  %v357_v47 = vshrl.u32 %v4653_v18, 16  ;;  %v4691_v57 = vld [vmem:[%s4514_s11 + $0x8c] sm:$0x1]  ;;  %v4705_v22 = vld [vmem:[%s4514_s11 + $0x34] sm:$0xf] }
  0x37   : > { %v4683_v50 = vcombine.low %v332_v25, %v342_v44  ;;  %v524_v51 = vsel %vm4559_vm4, %v519_v34, %v523_v21  ;;  %v349_v52 = vrot.slane %v347_v39, 5  ;;  %v355_v53 = vrot.slane %v353_v40, 5  ;;  %4221 = vmatprep.subr.msk.bf16.mxu1 %vm754_vm0, %v4661_v24 }
  0x38   : > { %v529_v4 = vrot.slane %v528_v45, 4  ;;  %v359_v55 = vrot.slane %v357_v47, 4  ;;  %v363_v56 = vshll.u32 %v4666_v29, 16  ;;  %v536_v60 = vshrl.u32 %v4674_v41, 16 }
  0x39   : > { %6098 = vst [vmem:[#allocation18_spill] sm:$0xff] %v4683_v50  ;;  %3915 = vmatprep.mubr.msk.bf16.mxu0 %vm705_vm3, %v4683_v50  ;;  %v350_v61 = vor.u32 %v349_v52, %v346_v46  ;;  %v539_v1 = vshll.u32 %v4674_v41, 16  ;;  %v545_v2 = vshll.u32 %v4681_v49, 16  ;;  %v549_v5 = vshrl.u32 %v4681_v49, 16  ;;  %v4716_v46 = vld [vmem:[%s4514_s11 + $0x38] sm:$0x1] }
  0x3a   : > { %v534_v12 = vsel %vm4559_vm4, %v529_v4, %v533_v35  ;;  %v360_v14 = vor.u32 %v359_v55, %v355_v53  ;;  %v365_v20 = vrot.slane %v363_v56, 5  ;;  %v538_v21 = vrot.slane %v536_v60, 4  ;;  %v4721_v52 = vld [vmem:[%s4514_s11 + $0x90] sm:$0xf] }
  0x3b   : > { %v4707_v25 = vcombine.low %v524_v51, %v534_v12  ;;  %v351_v26 = vrot.slane %v350_v61, 4  ;;  %v541_v28 = vrot.slane %v539_v1, 5  ;;  %v547_v33 = vrot.slane %v545_v2, 5  ;;  %v4726_v61 = vld [vmem:[%s4514_s11 + $0x94] sm:$0xf] }
  0x3c   : > { %v361_v34 = vrot.slane %v360_v14, 4  ;;  %v551_v39 = vrot.slane %v549_v5, 4  ;;  %v555_v40 = vshll.u32 %v4691_v57, 16  ;;  %v368_v44 = vshrl.u32 %v4700_v9, 16 }
  0x3d   : > { %6099 = vst [vmem:[#allocation19_spill] sm:$0xff] %v4707_v25  ;;  %3931 = vmatprep.mubr.msk.bf16.mxu1 %vm705_vm3, %v4707_v25  ;;  %v356_v35 = vsel %vm4559_vm4, %v351_v26, %v355_v53  ;;  %v542_v45 = vor.u32 %v541_v28, %v538_v21  ;;  %v371_v47 = vshll.u32 %v4700_v9, 16  ;;  %v377_v51 = vshll.u32 %v4705_v22, 16  ;;  %v4772_v25 = vld [vmem:[%s4514_s11 + $0xa0] sm:$0xf] }
  0x3e   : > { %v366_v4 = vsel %vm4559_vm4, %v361_v34, %v365_v20  ;;  %v552_v55 = vor.u32 %v551_v39, %v547_v33  ;;  %v557_v56 = vrot.slane %v555_v40, 5  ;;  %v370_v60 = vrot.slane %v368_v44, 4  ;;  %v4738_v34 = vld [vmem:[%s4514_s11 + $0x98] sm:$0x1]  ;;  %v4743_v44 = vld [vmem:[%s4514_s11 + $0x3c] sm:$0xf] }
  0x3f   : > { %v4728_v53 = vcombine.low %v356_v35, %v366_v4  ;;  %v543_v1 = vrot.slane %v542_v45, 4  ;;  %v373_v2 = vrot.slane %v371_v47, 5  ;;  %v379_v5 = vrot.slane %v377_v51, 5  ;;  %v4748_v4 = vld [vmem:[%s4514_s11 + $0x40] sm:$0xf] }
  0x40   : > { %v553_v12 = vrot.slane %v552_v55, 4  ;;  %v381_v14 = vshrl.u32 %v4705_v22, 16  ;;  %v387_v21 = vshll.u32 %v4716_v46, 16  ;;  %v560_v20 = vshrl.u32 %v4721_v52, 16 }
  0x41   : > { %6100 = vst [vmem:[#allocation20_spill] sm:$0xff] %v4728_v53  ;;  %3916 = vmatmul.mubr.msk.bf16.gmra.mxu0 %vm705_vm3, %v4728_v53  ;;  %v548_v26 = vsel %vm4559_vm4, %v543_v1, %v547_v33  ;;  %v374_v28 = vor.u32 %v373_v2, %v370_v60  ;;  %v563_v39 = vshll.u32 %v4721_v52, 16  ;;  %v569_v40 = vshll.u32 %v4726_v61, 16 }
  0x42   : > { %v558_v35 = vsel %vm4559_vm4, %v553_v12, %v557_v56  ;;  %v383_v45 = vrot.slane %v381_v14, 4  ;;  %v389_v47 = vrot.slane %v387_v21, 5  ;;  %v562_v51 = vrot.slane %v560_v20, 4  ;;  %v4760_v14 = vld [vmem:[%s4514_s11 + $0x44] sm:$0x1] }
  0x43   : > { %v4750_v33 = vcombine.low %v548_v26, %v558_v35  ;;  %v375_v55 = vrot.slane %v374_v28, 4  ;;  %v565_v60 = vrot.slane %v563_v39, 5  ;;  %v571_v1 = vrot.slane %v569_v40, 5  ;;  %v4765_v26 = vld [vmem:[%s4514_s11 + $0x9c] sm:$0xf] }
  0x44   : > { %v384_v2 = vor.u32 %v383_v45, %v379_v5  ;;  %v573_v36 = vshrl.u32 %v4726_v61, 16  ;;  %v579_v63 = vshll.u32 %v4738_v34, 16  ;;  %v392_v15 = vshrl.u32 %v4743_v44, 16 }
  0x45   : > { %6101 = vst [vmem:[#allocation21_spill] sm:$0xff] %v4750_v33  ;;  %3932 = vmatmul.mubr.msk.bf16.gmra.mxu1 %vm705_vm3, %v4750_v33  ;;  %v380_v56 = vsel %vm4559_vm4, %v375_v55, %v379_v5  ;;  %v566_v12 = vor.u32 %v565_v60, %v562_v51  ;;  %v395_v21 = vshll.u32 %v4743_v44, 16  ;;  %v401_v20 = vshll.u32 %v4748_v4, 16 }
  0x46   : > { %v385_v28 = vrot.slane %v384_v2, 4  ;;  %v575_v39 = vrot.slane %v573_v36, 4  ;;  %v581_v40 = vrot.slane %v579_v63, 5  ;;  %v394_v35 = vrot.slane %v392_v15, 4 }
  0x47   : > { %v567_v45 = vrot.slane %v566_v12, 4  ;;  %v397_v62 = vrot.slane %v395_v21, 5  ;;  %v403_v33 = vrot.slane %v401_v20, 5  ;;  %v405_v5 = vshrl.u32 %v4748_v4, 16  ;;  %v4780_v21 = vld [vmem:[%s4514_s11 + $0xa4] sm:$0x1] }
  0x48   : > { %v390_v51 = vsel %vm4559_vm4, %v385_v28, %v389_v47  ;;  %v576_v55 = vor.u32 %v575_v39, %v571_v1  ;;  %v411_v60 = vshll.u32 %v4760_v14, 16  ;;  %v584_v2 = vshrl.u32 %v4765_v26, 16  ;;  %6103 = vst [vmem:[#allocation23_spill] sm:$0xff] %v4780_v21  ;;  %v4783_v20 = vld [vmem:[%s4514_s11 + $0x48] sm:$0xf] }
  0x49   : > { %v4775_v36 = vcombine.low %v380_v56, %v390_v51  ;;  %v572_v15 = vsel %vm4559_vm4, %v567_v45, %v571_v1  ;;  %v398_v63 = vor.u32 %v397_v62, %v394_v35  ;;  %v407_v12 = vrot.slane %v405_v5, 4 }
  0x4a   : > { %v577_v47 = vrot.slane %v576_v55, 4  ;;  %v413_v28 = vrot.slane %v411_v60, 5  ;;  %v586_v39 = vrot.slane %v584_v2, 4  ;;  %v587_v19 = vshll.u32 %v4765_v26, 16  ;;  %v4794_v55 = vld [vmem:[%s4514_s11 + $0x4c] sm:$0xf] }
  0x4b   : > { %6102 = vst [vmem:[#allocation22_spill] sm:$0xff] %v4775_v36  ;;  %3919 = vmatprep.mubr.msk.bf16.mxu0 %vm705_vm3, %v4775_v36  ;;  %v399_v56 = vrot.slane %v398_v63, 4  ;;  %v408_v51 = vor.u32 %v407_v12, %v403_v33  ;;  %v593_v1 = vshll.u32 %v4772_v25, 16  ;;  %v597_v62 = vshrl.u32 %v4772_v25, 16  ;;  %v4802_v36 = vld [vmem:[%s4514_s11 + $0x50] sm:$0x1] }
  0x4c   : > { %v582_v35 = vsel %vm4559_vm4, %v577_v47, %v581_v40  ;;  %v589_v45 = vrot.slane %v587_v19, 5  ;;  %v603_v5 = vshll.u32 %v4780_v21, 16  ;;  %v416_v60 = vshrl.u32 %v4783_v20, 16  ;;  %v4805_v47 = vld [vmem:[%s4514_s11 + $0xa8] sm:$0xf] }
  0x4d   : > { %v4797_v2 = vcombine.low %v572_v15, %v582_v35  ;;  %v404_v63 = vsel %vm4559_vm4, %v399_v56, %v403_v33  ;;  %v409_v12 = vrot.slane %v408_v51, 4  ;;  %v595_v11 = vrot.slane %v593_v1, 5  ;;  %6105 = vst [vmem:[#allocation25_spill] sm:$0xff] %v4805_v47 }
  0x4e   : > { %v590_v53 = vor.u32 %v589_v45, %v586_v39  ;;  %v599_v50 = vrot.slane %v597_v62, 4  ;;  %v605_v40 = vrot.slane %v603_v5, 5  ;;  %v418_v19 = vrot.slane %v416_v60, 4  ;;  %v4818_v45 = vld [vmem:[%s4514_s11 + $0xac] sm:$0xf] }
  0x4f   : > { %6104 = vst [vmem:[#allocation24_spill] sm:$0xff] %v4797_v2  ;;  %3935 = vmatprep.mubr.msk.bf16.mxu1 %vm705_vm3, %v4797_v2  ;;  %v414_v15 = vsel %vm4559_vm4, %v409_v12, %v413_v28  ;;  %v419_v33 = vshll.u32 %v4783_v20, 16  ;;  %v425_v56 = vshll.u32 %v4794_v55, 16  ;;  %v429_v51 = vshrl.u32 %v4794_v55, 16  ;;  %6107 = vst [vmem:[#allocation27_spill] sm:$0xff] %v4818_v45 }
  0x50   : > { %v4814_v1 = vcombine.low %v404_v63, %v414_v15  ;;  %v591_v39 = vrot.slane %v590_v53, 4  ;;  %v600_v62 = vor.u32 %v599_v50, %v595_v11  ;;  %v435_v35 = vshll.u32 %v4802_v36, 16 }
  0x51   : > { %v421_v5 = vrot.slane %v419_v33, 5  ;;  %v427_v60 = vrot.slane %v425_v56, 5  ;;  %v431_v2 = vrot.slane %v429_v51, 4  ;;  %v608_v28 = vshrl.u32 %v4805_v47, 16  ;;  %v4831_v51 = vld [vmem:[%s4514_s11 + $0x54] sm:$0xf] }
  0x52   : > { %6106 = vst [vmem:[#allocation26_spill] sm:$0xff] %v4814_v1  ;;  %3920 = vmatmul.mubr.msk.bf16.gmra.mxu0 %vm705_vm3, %v4814_v1  ;;  %v596_v53 = vsel %vm4559_vm4, %v591_v39, %v595_v11  ;;  %v601_v50 = vrot.slane %v600_v62, 4  ;;  %v437_v63 = vrot.slane %v435_v35, 5  ;;  %v611_v12 = vshll.u32 %v4805_v47, 16  ;;  %v4838_v62 = vld [vmem:[%s4514_s11 + $0x58] sm:$0xf] }
  0x53   : > { %v422_v15 = vor.u32 %v421_v5, %v418_v19  ;;  %v432_v58 = vor.u32 %v431_v2, %v427_v60  ;;  %v610_v33 = vrot.slane %v608_v28, 4  ;;  %v617_v56 = vshll.u32 %v4818_v45, 16 }
  0x54   : > { %v606_v1 = vsel %vm4559_vm4, %v601_v50, %v605_v40  ;;  %v613_v37 = vrot.slane %v611_v12, 5  ;;  %v621_v11 = vshrl.u32 %v4818_v45, 16  ;;  %v627_v39 = vshll.u32 %v4821_v38, 16 }
  0x55   : > { %v4840_v2 = vcombine.low %v596_v53, %v606_v1  ;;  %v423_v19 = vrot.slane %v422_v15, 4  ;;  %v433_v35 = vrot.slane %v432_v58, 4  ;;  %v619_v5 = vrot.slane %v617_v56, 5 }
  0x56   : > { %v614_v28 = vor.u32 %v613_v37, %v610_v33  ;;  %v623_v0 = vrot.slane %v621_v11, 4  ;;  %v629_v54 = vrot.slane %v627_v39, 5  ;;  %v440_v40 = vshrl.u32 %v4831_v51, 16  ;;  %v4855_v37 = vld [vmem:[%s4514_s11 + $0xb4] sm:$0xf] }
  0x57   : > { %6109 = vst [vmem:[#allocation29_spill] sm:$0xff] %v4840_v2  ;;  %3936 = vmatmul.mubr.msk.bf16.gmra.mxu1 %vm705_vm3, %v4840_v2  ;;  %v428_v50 = vsel %vm4559_vm4, %v423_v19, %v427_v60  ;;  %v438_v1 = vsel %vm4559_vm4, %v433_v35, %v437_v63  ;;  %v443_v58 = vshll.u32 %v4831_v51, 16  ;;  %v449_v53 = vshll.u32 %v4838_v62, 16  ;;  %6110 = vst [vmem:[#allocation30_spill] sm:$0xff] %v4855_v37  ;;  %v4860_v11 = vld [vmem:[%s4514_s11 + $0xb8] sm:$0xf] }
  0x58   : > { %v4857_v12 = vcombine.low %v428_v50, %v438_v1  ;;  %v615_v15 = vrot.slane %v614_v28, 4  ;;  %v624_v33 = vor.u32 %v623_v0, %v619_v5  ;;  %v442_v56 = vrot.slane %v440_v40, 4 }
  0x59   : > { %v445_v39 = vrot.slane %v443_v58, 5  ;;  %v451_v2 = vrot.slane %v449_v53, 5  ;;  %v453_v60 = vshrl.u32 %v4838_v62, 16  ;;  %v459_v63 = vshll.u32 %v4843_v48, 16  ;;  %v4871_v58 = vld [vmem:[%s4514_s11 + $0xbc] sm:$0x1] }
  0x5a   : > { %6111 = vst [vmem:[#allocation31_spill] sm:$0xff] %v4857_v12  ;;  %3923 = vmatprep.mubr.msk.bf16.mxu0 %vm705_vm3, %v4857_v12  ;;  %v620_v19 = vsel %vm4559_vm4, %v615_v15, %v619_v5  ;;  %v625_v35 = vrot.slane %v624_v33, 4  ;;  %v632_v28 = vshrl.u32 %v4855_v37, 16  ;;  %v635_v0 = vshll.u32 %v4855_v37, 16 }
  0x5b   : > { %v446_v40 = vor.u32 %v445_v39, %v442_v56  ;;  %v455_v50 = vrot.slane %v453_v60, 4  ;;  %v461_v1 = vrot.slane %v459_v63, 5  ;;  %v641_v53 = vshll.u32 %v4860_v11, 16 }
  0x5c   : > { %v630_v38 = vsel %vm4559_vm4, %v625_v35, %v629_v54  ;;  %v634_v47 = vrot.slane %v632_v28, 4  ;;  %v637_v12 = vrot.slane %v635_v0, 5  ;;  %v645_v45 = vshrl.u32 %v4860_v11, 16 }
  0x5d   : > { %v4877_v5 = vcombine.low %v620_v19, %v630_v38  ;;  %v447_v15 = vrot.slane %v446_v40, 4  ;;  %v456_v33 = vor.u32 %v455_v50, %v451_v2  ;;  %v643_v21 = vrot.slane %v641_v53, 5 }
  0x5e   : > { %v638_v37 = vor.u32 %v637_v12, %v634_v47  ;;  %v647_v56 = vrot.slane %v645_v45, 4  ;;  %v651_v39 = vshll.u32 %v4871_v58, 16  ;;  %v3430_v54 = vrot.slane %v4523_v6, 9 }
  0x5f   : > { %3939 = vmatprep.mubr.msk.bf16.mxu1 %vm705_vm3, %v4877_v5  ;;  %v452_v38 = vsel %vm4559_vm4, %v447_v15, %v451_v2  ;;  %v457_v63 = vrot.slane %v456_v33, 4  ;;  %v1232_v47 = vrot.slane %v4526_v7, 5  ;;  %v4894_v45 = vcombine.low %v4552_v30, %v4555_v31 }
  0x60   : > { %v639_v12 = vrot.slane %v638_v37, 4  ;;  %v648_v19 = vor.u32 %v647_v56, %v643_v21  ;;  %v653_v35 = vrot.slane %v651_v39, 5  ;;  %v3431_v28 = vrot.slane %v4552_v30, 9 }
  0x61   : > { %v462_v0 = vsel %vm4559_vm4, %v457_v63, %v461_v1  ;;  %v1233_v40 = vsel %vm4882_vm7, %v3430_v54, %v1232_v47  ;;  %v1234_v50 = vrot.slane %v1232_v47, 4  ;;  %v6114_v2 = vrot.slane %v4555_v31, 5 }
  0x62   : > { %v4903_v15 = vcombine.low %v452_v38, %v462_v0  ;;  %v644_v33 = vsel %vm4559_vm4, %v639_v12, %v643_v21  ;;  %v649_v37 = vrot.slane %v648_v19, 4  ;;  %v6116_v1 = vrot.slane %v4529_v8, 5 }
  0x63   : > { %v1241_v53 = vrot.slane %v6114_v2, 4  ;;  %v6115_v56 = vmov %v6114_v2  ;;  %v6117_v54 = vrot.slane %v4566_v42, 5  ;;  %v4921_v63 = vcombine.low %v4595_v10, %v4604_v23 }
  0x64   : > { %v1240_v30 = vsel %vm4882_vm7, %v3431_v28, %v6115_v56  ;;  %v1236_v39 = vsel %vm4882_vm7, %v1234_v50, %v6116_v1  ;;  %v3432_v21 = vrot.slane %v4595_v10, 9  ;;  %3924 = vmatmul.mubr.msk.bf16.gmra.mxu0 %vm705_vm3, %v4903_v15  ;;  %v654_v8 = vsel %vm4559_vm4, %v649_v37, %v653_v35 }
  0x65   : > { %v1243_v38 = vsel %vm4882_vm7, %v1241_v53, %v6117_v54  ;;  %v3447_v31 = vcombine.low %v1233_v40, %v1236_v39  ;;  %v1246_v42 = vrot.slane %v4604_v23, 5  ;;  %v4931_v12 = vcombine.low %v644_v33, %v654_v8 }
  0x66   : > { %v4928_v47 = vcombine.low %v1240_v30, %v1243_v38  ;;  %v1249_v19 = vrot.slane %v4611_v27, 5  ;;  %v1253_v0 = vrot.slane %v4653_v18, 5  ;;  %v3433_v35 = vrot.slane %v4645_v3, 9 }
  0x67   : > { %6118 = vst [vmem:[#allocation32_spill] sm:$0xff] %v4931_v12  ;;  %3979 = vmatprep.mubr.msk.bf16.mxu0 %vm705_vm3, %v3447_v31  ;;  %v1247_v10 = vsel %vm4882_vm7, %v3432_v21, %v1246_v42  ;;  %v1248_v28 = vrot.slane %v1246_v42, 4  ;;  %3940 = vmatmul.mubr.msk.bf16.gmra.mxu1 %vm705_vm3, %v4931_v12  ;;  %v3434_v40 = vrot.slane %v4700_v9, 9  ;;  %v1260_v23 = vrot.slane %v4705_v22, 5 }
  0x68   : > { %v6119_v27 = vcombine.low %v4523_v6, %v4526_v7  ;;  %v1255_v2 = vrot.slane %v1253_v0, 4  ;;  %v1256_v53 = vrot.slane %v4666_v29, 5  ;;  %v1263_v33 = vrot.slane %v4716_v46, 5  ;;  %v4966_v46 = vld [vmem:[%s6038_s1 + $0xc] sm:$0x3] }
  0x69   : > { %v1250_v50 = vsel %vm4882_vm7, %v1248_v28, %v1249_v19  ;;  %v1262_v56 = vrot.slane %v1260_v23, 4  ;;  %v1875_v30 = vsel %vm754_vm0, %v4626_v43, 0  ;;  %v1267_v1 = vrot.slane %v4748_v4, 5  ;;  %v4983_v19 = vld [vmem:[%s6038_s1 + $0xa] sm:$0x3] }
  0x6a   : > { %3945 = vmatprep.mubr.msk.bf16.mxu1 %vm705_vm3, %v6119_v27  ;;  %v4951_v37 = vcombine.low %v1247_v10, %v1250_v50  ;;  %v1647_v6 = vsel %vm754_vm0, %v4661_v24, 0  ;;  %v1254_v7 = vsel %vm4882_vm7, %v3433_v35, %v1253_v0  ;;  %v1261_v39 = vsel %vm4882_vm7, %v3434_v40, %v1260_v23 }
  0x6b   : > { %v1274_v29 = vrot.slane %v4794_v55, 5  ;;  %v1257_v43 = vsel %vm4882_vm7, %v1255_v2, %v1256_v53  ;;  %v1264_v24 = vsel %vm4882_vm7, %v1262_v56, %v1263_v33  ;;  %v3435_v54 = vrot.slane %v4743_v44, 9 }
  0x6c   : > { %3980 = vmatmul.mubr.msk.bf16.vlgmr.msra.gmra.mxu0 %vm705_vm3, %v4928_v47  ;;  %v1270_v38 = vrot.slane %v4760_v14, 5  ;;  %v1269_v21 = vrot.slane %v1267_v1, 4  ;;  %v3436_v8 = vrot.slane %v4783_v20, 9  ;;  %v1277_v42 = vrot.slane %v4802_v36, 5 }
  0x6d   : > { %4046 = vmatpush3.bf16.msra.mxu0 %v1875_v30  ;;  %3983 = vmatprep.mubr.msk.bf16.mxu0 %vm705_vm3, %v4951_v37  ;;  %v1276_v31 = vrot.slane %v1274_v29, 4  ;;  %v4991_v14 = vcombine.low %v1254_v7, %v1257_v43  ;;  %v4993_v10 = vcombine.low %v1261_v39, %v1264_v24  ;;  %v1268_v36 = vsel %vm4882_vm7, %v3435_v54, %v1267_v1 }
  0x6e   : > { %4224 = vmatprep.subr.msk.bf16.mxu0 %vm754_vm0, %v4966_v46  ;;  %v1271_v28 = vsel %vm4882_vm7, %v1269_v21, %v1270_v38  ;;  %v1275_v0 = vsel %vm4882_vm7, %v3436_v8, %v1274_v29  ;;  %v1281_v40 = vrot.slane %v4838_v62, 5  ;;  %v1291_v23 = vrot.slane %v4544_v17, 5  ;;  %v6120_v8 = vld [vmem:[#allocation23_spill] sm:$0xff] }
  0x6f   : > { %3946 = vmatmul.mubr.msk.bf16.vlgmr.msra.gmra.mxu1 %vm705_vm3, %v4894_v45  ;;  %v1278_v35 = vsel %vm4882_vm7, %v1276_v31, %v1277_v42  ;;  %v3437_v27 = vrot.slane %v4831_v51, 9  ;;  %v3438_v50 = vrot.slane %v4536_v13, 9  ;;  %v1288_v2 = vrot.slane %v4541_v16, 5  ;;  %v6121_v42 = vld [vmem:[#allocation27_spill] sm:$0xff] }
  0x70   : > { %4012 = vmatpush3.bf16.msra.mxu1 %v1647_v6  ;;  %3949 = vmatprep.mubr.msk.bf16.mxu1 %vm705_vm3, %v4921_v63  ;;  %v5012_v53 = vcombine.low %v4645_v3, %v4653_v18  ;;  %v5016_v33 = vcombine.low %v4700_v9, %v4705_v22  ;;  %v5020_v56 = vcombine.low %v4743_v44, %v4748_v4  ;;  %v1284_v3 = vrot.slane %v4843_v48, 5 }
  0x71   : > { %4223 = vmatprep.subr.msk.bf16.mxu1 %vm754_vm0, %v4983_v19  ;;  %v5024_v17 = vcombine.low %v4783_v20, %v4794_v55  ;;  %v5028_v30 = vcombine.low %v1268_v36, %v1271_v28  ;;  %v5030_v1 = vcombine.low %v1275_v0, %v1278_v35  ;;  %v5035_v18 = vcombine.low %v4674_v41, %v4681_v49  ;;  %v6122_v36 = vld [vmem:[#allocation25_spill] sm:$0xff] }
  0x72   : > { %v1283_v9 = vrot.slane %v1281_v40, 4  ;;  %v3441_v22 = vrot.slane %v4674_v41, 9  ;;  %v1309_v44 = vrot.slane %v4681_v49, 5  ;;  %v1312_v4 = vrot.slane %v4691_v57, 5 }
  0x73   : > { %v1282_v20 = vsel %vm4882_vm7, %v3437_v27, %v1281_v40  ;;  %v1289_v48 = vsel %vm4882_vm7, %v3438_v50, %v1288_v2  ;;  %v1290_v55 = vrot.slane %v1288_v2, 4  ;;  %v5048_v6 = vcombine.low %v4721_v52, %v4726_v61  ;;  %v6123_v40 = vld [vmem:[#allocation28_spill] sm:$0xff] }
  0x74   : > { %3984 = vmatmul.mubr.msk.bf16.gmra.mxu0 %vm705_vm3, %v4991_v14  ;;  %v1310_v41 = vsel %vm4882_vm7, %v3441_v22, %v1309_v44  ;;  %v1311_v49 = vrot.slane %v1309_v44, 4  ;;  %v3442_v57 = vrot.slane %v4721_v52, 9  ;;  %v1316_v7 = vrot.slane %v4726_v61, 5 }
  0x75   : > { %3987 = vmatprep.mubr.msk.bf16.mxu0 %vm705_vm3, %v4993_v10  ;;  %v1295_v39 = vrot.slane %v4581_v59, 5  ;;  %v1319_v29 = vrot.slane %v4738_v34, 5  ;;  %v5062_v43 = vcombine.low %v4765_v26, %v4772_v25  ;;  %v3443_v24 = vrot.slane %v4765_v26, 9 }
  0x76   : > { %v1285_v54 = vsel %vm4882_vm7, %v1283_v9, %v1284_v3  ;;  %v1313_v52 = vsel %vm4882_vm7, %v1311_v49, %v1312_v4  ;;  %v1317_v61 = vsel %vm4882_vm7, %v3442_v57, %v1316_v7  ;;  %v1318_v38 = vrot.slane %v1316_v7, 4  ;;  %v6124_v3 = vld [vmem:[#allocation30_spill] sm:$0xff]  ;;  %v6125_v57 = vld [vmem:[#allocation15_spill] sm:$0xff] }
  0x77   : > { %3950 = vmatmul.mubr.msk.bf16.gmra.mxu1 %vm705_vm3, %v5012_v53  ;;  %v5071_v21 = vcombine.low %v1310_v41, %v1313_v52  ;;  %v1323_v34 = vrot.slane %v4772_v25, 5  ;;  %v1326_v31 = vrot.slane %v6120_v8, 5  ;;  %v5077_v28 = vcombine.low %v6122_v36, %v6121_v42 }
  0x78   : > { %3953 = vmatprep.mubr.msk.bf16.mxu1 %vm705_vm3, %v5016_v33  ;;  %v1320_v26 = vsel %vm4882_vm7, %v1318_v38, %v1319_v29  ;;  %v3444_v0 = vrot.slane %v6122_v36, 9  ;;  %v1330_v35 = vrot.slane %v6121_v42, 5  ;;  %v1333_v27 = vrot.slane %v6123_v40, 5  ;;  %v6127_v42 = vld [vmem:[#allocation11_spill] sm:$0xff] }
  0x79   : > { %v5086_v50 = vcombine.low %v1317_v61, %v1320_v26  ;;  %v1324_v25 = vsel %vm4882_vm7, %v3443_v24, %v1323_v34  ;;  %v1325_v2 = vrot.slane %v1323_v34, 4  ;;  %v5092_v9 = vcombine.low %v6124_v3, %v4860_v11 }
  0x7a   : > { %v1331_v22 = vsel %vm4882_vm7, %v3444_v0, %v1330_v35  ;;  %v1332_v44 = vrot.slane %v1330_v35, 4  ;;  %v3445_v4 = vrot.slane %v6124_v3, 9  ;;  %v1337_v41 = vrot.slane %v4860_v11, 5  ;;  %v6128_v0 = vld [vmem:[#allocation13_spill] sm:$0xff] }
  0x7b   : > { %v1292_v49 = vsel %vm4882_vm7, %v1290_v55, %v1291_v23  ;;  %v1302_v7 = vrot.slane %v6125_v57, 5  ;;  %v1327_v29 = vsel %vm4882_vm7, %v1325_v2, %v1326_v31  ;;  %v1340_v24 = vrot.slane %v4871_v58, 5  ;;  %v6126_v55 = vld [vmem:[#allocation10_spill] sm:$0xff] }
  0x7c   : > { %3988 = vmatmul.mubr.msk.bf16.gmra.mxu0 %vm705_vm3, %v5028_v30  ;;  %v5108_v52 = vcombine.low %v1324_v25, %v1327_v29  ;;  %v1334_v61 = vsel %vm4882_vm7, %v1332_v44, %v1333_v27  ;;  %v1338_v11 = vsel %vm4882_vm7, %v3445_v4, %v1337_v41  ;;  %v1339_v38 = vrot.slane %v1337_v41, 4  ;;  %v6129_v27 = vld [vmem:[#allocation16_spill] sm:$0xff]  ;;  %v263_v41 = vld [vmem:[%s4514_s11 + $0xc8] sm:$0x1] }
  0x7d   : > { %3991 = vmatprep.mubr.msk.bf16.mxu0 %vm705_vm3, %v5030_v1  ;;  %v5116_v23 = vcombine.low %v1282_v20, %v1285_v54  ;;  %v3439_v34 = vrot.slane %v6126_v55, 9  ;;  %v5119_v58 = vcombine.low %v1331_v22, %v1334_v61  ;;  %v5121_v8 = vcombine.low %v1289_v48, %v1292_v49  ;;  %v5195_v4 = vld [vmem:[%s4514_s11 + $0xc0] sm:$0xf]  ;;  %v6130_v61 = vld [vmem:[#allocation14_spill] sm:$0xff] }
  0x7e   : > { %v1297_v31 = vrot.slane %v1295_v39, 4  ;;  %v1298_v36 = vrot.slane %v6127_v42, 5  ;;  %v1341_v26 = vsel %vm4882_vm7, %v1339_v38, %v1340_v24  ;;  %v3440_v35 = vrot.slane %v6128_v0, 9  ;;  %v6132_v42 = vld [vmem:[#allocation20_spill] sm:$0xff] }
  0x7f   : > { %3954 = vmatmul.mubr.msk.bf16.gmra.mxu1 %vm705_vm3, %v5020_v56  ;;  %v1304_v40 = vrot.slane %v1302_v7, 4  ;;  %v1305_v25 = vrot.slane %v6129_v27, 5  ;;  %v5128_v2 = vcombine.low %v1338_v11, %v1341_v26  ;;  %v5132_v20 = vcombine.low %v4831_v51, %v4838_v62  ;;  %v6136_v26 = vld [vmem:[#allocation12_spill] sm:$0xff] }
  0x80   : > { %3957 = vmatprep.mubr.msk.bf16.mxu1 %vm705_vm3, %v5024_v17  ;;  %v5138_v48 = vcombine.low %v4536_v13, %v4541_v16  ;;  %v1296_v54 = vsel %vm4882_vm7, %v3439_v34, %v1295_v39  ;;  %v1299_v3 = vsel %vm4882_vm7, %v1297_v31, %v1298_v36  ;;  %v1303_v51 = vsel %vm4882_vm7, %v3440_v35, %v1302_v7  ;;  %v6131_v34 = vld [vmem:[#allocation18_spill] sm:$0xff]  ;;  %v6135_v36 = vld [vmem:[#allocation31_spill] sm:$0xff] }
  0x81   : > { %v1306_v62 = vsel %vm4882_vm7, %v1304_v40, %v1305_v25  ;;  %v5154_v13 = vcombine.low %v1296_v54, %v1299_v3  ;;  %v5160_v39 = vcombine.low %v6126_v55, %v4581_v59  ;;  %v5166_v22 = vcombine.low %v6128_v0, %v6125_v57  ;;  %v5189_v59 = vld [vmem:[%s4514_s11 + $0xc4] sm:$0xf]  ;;  %v3571_v55 = vld [vmem:[%s6038_s1 + $0x10] sm:$0x3]  ;;  %v6138_v35 = vld [vmem:[#allocation19_spill] sm:$0xff] }
  0x82   : > { %v5156_v16 = vcombine.low %v1303_v51, %v1306_v62  ;;  %v2073_v44 = vrot.slane %v5189_v59, 5  ;;  %v3515_v49 = vrot.slane %v5195_v4, 9  ;;  %v2076_v7 = vrot.slane %v263_v41, 5  ;;  %v6137_v0 = vld [vmem:[#allocation17_spill] sm:$0xff] }
  0x83   : > { %v2293_v38 = vsel %vm754_vm0, %v4966_v46, 0  ;;  %v2087_v31 = vsel %vm754_vm0, %v4983_v19, 0  ;;  %v6133_v46 = vld [vmem:[#allocation22_spill] sm:$0xff]  ;;  %v6139_v40 = vld [vmem:[#allocation21_spill] sm:$0xff]  ;;  %v1843_v27 = vshrl.u32 %v5195_v4, 16  ;;  %v1846_v25 = vshll.u32 %v5195_v4, 16 }
  0x84   : > { %3992 = vmatmul.mubr.msk.bf16.gmra.mxu0 %vm705_vm3, %v5116_v23  ;;  %v2075_v57 = vrot.slane %v2073_v44, 4  ;;  %v2074_v29 = vsel %vm4882_vm7, %v3515_v49, %v2073_v44  ;;  %v6134_v19 = vld [vmem:[#allocation26_spill] sm:$0xff]  ;;  %v1856_v54 = vshrl.u32 %v5189_v59, 16  ;;  %v1852_v3 = vshll.u32 %v5189_v59, 16 }
  0x85   : > { %3995 = vmatprep.mubr.msk.bf16.mxu0 %vm705_vm3, %v5121_v8  ;;  %v1845_v51 = vrot.slane %v1843_v27, 4  ;;  %v1848_v62 = vrot.slane %v1846_v25, 5 }
  0x86   : > { %v2077_v24 = vsel %vm4882_vm7, %v2075_v57, %v2076_v7  ;;  %v1854_v44 = vrot.slane %v1852_v3, 5  ;;  %v1858_v49 = vrot.slane %v1856_v54, 4  ;;  %v6140_v57 = vld [vmem:[#allocation24_spill] sm:$0xff]  ;;  %v6141_v7 = vld [vmem:[#allocation29_spill] sm:$0xff]  ;;  %v3480_v3 = vcombine.low %v5195_v4, %v5189_v59 }
  0x87   : > { %3958 = vmatmul.mubr.msk.bf16.gmra.mxu1 %vm705_vm3, %v5132_v20  ;;  %v5207_v11 = vcombine.low %v2074_v29, %v2077_v24  ;;  %v1849_v29 = vor.u32 %v1848_v62, %v1845_v51  ;;  %v2733_v51 = vsel %vm754_vm0, %v3571_v55, 0 }
  0x88   : > { %3961 = vmatprep.mubr.msk.bf16.mxu1 %vm705_vm3, %v5138_v48  ;;  %v1859_v24 = vor.u32 %v1858_v49, %v1854_v44 }
  0x8c   : > { %3996 = vmatmul.mubr.msk.bf16.gmra.mxu0 %vm705_vm3, %v5154_v13 }
  0x8d   : > { %3999 = vmatprep.mubr.msk.bf16.mxu0 %vm705_vm3, %v5156_v16 }
  0x8f   : > { %3962 = vmatmul.mubr.msk.bf16.gmra.mxu1 %vm705_vm3, %v5160_v39 }
  0x90   : > { %3965 = vmatprep.mubr.msk.bf16.mxu1 %vm705_vm3, %v5166_v22 }
  0x94   : > { %4000 = vmatmul.mubr.msk.bf16.gmra.mxu0 %vm705_vm3, %v5071_v21 }
  0x95   : > { %4003 = vmatprep.mubr.msk.bf16.mxu0 %vm705_vm3, %v5086_v50 }
  0x97   : > { %3966 = vmatmul.mubr.msk.bf16.gmra.mxu1 %vm705_vm3, %v5035_v18 }
  0x98   : > { %3969 = vmatprep.mubr.msk.bf16.mxu1 %vm705_vm3, %v5048_v6 }
  0x9c   : > { %4004 = vmatmul.mubr.msk.bf16.gmra.mxu0 %vm705_vm3, %v5108_v52 }
  0x9d   : > { %4007 = vmatprep.mubr.msk.bf16.mxu0 %vm705_vm3, %v5119_v58 }
  0x9f   : > { %3970 = vmatmul.mubr.msk.bf16.gmra.mxu1 %vm705_vm3, %v5062_v43 }
  0xa0   : > { %3973 = vmatprep.mubr.msk.bf16.mxu1 %vm705_vm3, %v5077_v28 }
  0xa4   : > { %4008 = vmatmul.mubr.msk.bf16.gmra.mxu0 %vm705_vm3, %v5128_v2 }
  0xa5   : > { %4047 = vmatprep.mubr.msk.bf16.mxu0 %vm705_vm3, %v6130_v61  ;;  %v1862_v61 = vshll.u32 %v263_v41, 16 }
  0xa7   : > { %3974 = vmatmul.mubr.msk.bf16.gmra.mxu1 %vm705_vm3, %v5092_v9  ;;  %v1864_v27 = vrot.slane %v1862_v61, 5  ;;  %v5399_v61 = vld [vmem:[%s4514_s11 + $0xd0] sm:$0xf] }
  0xa8   : > { %4013 = vmatprep.mubr.msk.bf16.mxu1 %vm705_vm3, %v4894_v45  ;;  %v3552_v45 = vld [vmem:[%s6038_s1 + $0xe] sm:$0x3] }
  0xa9   : > { %v2521_v62 = vsel %vm754_vm0, %v3552_v45, 0 }
  0xac   : > { %4048 = vmatmul.mubr.msk.bf16.vlgmr.msra.gmra.mxu0 %vm705_vm3, %v6131_v34 }
  0xad   : > { %4114 = vmatpush3.bf16.msra.mxu0 %v2293_v38  ;;  %4051 = vmatprep.mubr.msk.bf16.mxu0 %vm705_vm3, %v6132_v42  ;;  %v1850_v38 = vrot.slane %v1849_v29, 4 }
  0xae   : > { %4226 = vmatprep.subr.msk.bf16.mxu0 %vm754_vm0, %v3571_v55 }
  0xaf   : > { %4014 = vmatmul.mubr.msk.bf16.vlgmr.msra.gmra.mxu1 %vm705_vm3, %v4921_v63  ;;  %v1855_v25 = vsel %vm4559_vm4, %v1850_v38, %v1854_v44 }
  0xb0   : > { %4080 = vmatpush3.bf16.msra.mxu1 %v2087_v31  ;;  %4017 = vmatprep.mubr.msk.bf16.mxu1 %vm705_vm3, %v5012_v53  ;;  %v1860_v31 = vrot.slane %v1859_v24, 4 }
  0xb1   : > { %4225 = vmatprep.subr.msk.bf16.mxu1 %vm754_vm0, %v3552_v45 }
  0xb2   : > { %v1865_v41 = vsel %vm4559_vm4, %v1860_v31, %v1864_v27 }
  0xb3   : > { %v5289_v54 = vcombine.low %v1855_v25, %v1865_v41 }
  0xb4   : > { %4052 = vmatmul.mubr.msk.bf16.gmra.mxu0 %vm705_vm3, %v6133_v46 }
  0xb5   : > { %4055 = vmatprep.mubr.msk.bf16.mxu0 %vm705_vm3, %v6134_v19  ;;  %6142 = vst [vmem:[#allocation23_spill] sm:$0xff] %v5289_v54 }
  0xb7   : > { %4018 = vmatmul.mubr.msk.bf16.gmra.mxu1 %vm705_vm3, %v5016_v33 }
  0xb8   : > { %4021 = vmatprep.mubr.msk.bf16.mxu1 %vm705_vm3, %v5020_v56 }
  0xbc   : > { %4056 = vmatmul.mubr.msk.bf16.gmra.mxu0 %vm705_vm3, %v6135_v36 }
  0xbd   : > { %4059 = vmatprep.mubr.msk.bf16.mxu0 %vm705_vm3, %v4903_v15 }
  0xbf   : > { %4022 = vmatmul.mubr.msk.bf16.gmra.mxu1 %vm705_vm3, %v5024_v17 }
  0xc0   : > { %4025 = vmatprep.mubr.msk.bf16.mxu1 %vm705_vm3, %v5132_v20 }
  0xc4   : > { %4060 = vmatmul.mubr.msk.bf16.gmra.mxu0 %vm705_vm3, %v6136_v26 }
  0xc5   : > { %4063 = vmatprep.mubr.msk.bf16.mxu0 %vm705_vm3, %v6137_v0 }
  0xc7   : > { %4026 = vmatmul.mubr.msk.bf16.gmra.mxu1 %vm705_vm3, %v5138_v48 }
  0xc8   : > { %4029 = vmatprep.mubr.msk.bf16.mxu1 %vm705_vm3, %v5160_v39 }
  0xcc   : > { %4064 = vmatmul.mubr.msk.bf16.gmra.mxu0 %vm705_vm3, %v6138_v35 }
  0xcd   : > { %4067 = vmatprep.mubr.msk.bf16.mxu0 %vm705_vm3, %v6139_v40 }
  0xcf   : > { %4030 = vmatmul.mubr.msk.bf16.gmra.mxu1 %vm705_vm3, %v5166_v22 }
  0xd0   : > { %4033 = vmatprep.mubr.msk.bf16.mxu1 %vm705_vm3, %v5035_v18 }
  0xd4   : > { %4068 = vmatmul.mubr.msk.bf16.gmra.mxu0 %vm705_vm3, %v6140_v57 }
  0xd5   : > { %4071 = vmatprep.mubr.msk.bf16.mxu0 %vm705_vm3, %v6141_v7 }
  0xd7   : > { %4034 = vmatmul.mubr.msk.bf16.gmra.mxu1 %vm705_vm3, %v5048_v6 }
  0xd8   : > { %4037 = vmatprep.mubr.msk.bf16.mxu1 %vm705_vm3, %v5062_v43 }
  0xdc   : > { %4072 = vmatmul.mubr.msk.bf16.gmra.mxu0 %vm705_vm3, %v4877_v5 }
  0xdd   : > { %4075 = vmatprep.mubr.msk.bf16.mxu0 %vm705_vm3, %v4931_v12 }
  0xdf   : > { %4038 = vmatmul.mubr.msk.bf16.gmra.mxu1 %vm705_vm3, %v5077_v28 }
  0xe0   : > { %4041 = vmatprep.mubr.msk.bf16.mxu1 %vm705_vm3, %v5092_v9 }
  0xe4   : > { %4076 = vmatmul.mubr.msk.bf16.gmra.mxu0 %vm705_vm3, %v5289_v54 }
  0xe5   : > { %4115 = vmatprep.mubr.msk.bf16.mxu0 %vm705_vm3, %v4921_v63 }
  0xe7   : > { %4042 = vmatmul.mubr.msk.bf16.gmra.mxu1 %vm705_vm3, %v3480_v3 }
  0xe8   : > { %4081 = vmatprep.mubr.msk.bf16.mxu1 %vm705_vm3, %v4928_v47 }
  0xec   : > { %4116 = vmatmul.mubr.msk.bf16.vlgmr.msra.gmra.mxu0 %vm705_vm3, %v5012_v53 }
  0xed   : > { %4182 = vmatpush3.bf16.msra.mxu0 %v2733_v51  ;;  %4119 = vmatprep.mubr.msk.bf16.mxu0 %vm705_vm3, %v5016_v33 }
  0xef   : > { %4082 = vmatmul.mubr.msk.bf16.vlgmr.msra.gmra.mxu1 %vm705_vm3, %v4951_v37 }
  0xf0   : > { %4148 = vmatpush3.bf16.msra.mxu1 %v2521_v62  ;;  %4085 = vmatprep.mubr.msk.bf16.mxu1 %vm705_vm3, %v4991_v14  ;;  %v5312_v63 = vpop.f32.mrf.mxu0 }
  0xf2   : > { %v5322_v53 = vpop.f32.mrf.mxu0 }
  0xf4   : > { %4120 = vmatmul.mubr.msk.bf16.gmra.mxu0 %vm705_vm3, %v5020_v56  ;;  %v5328_v56 = vpop.f32.mrf.mxu0 }
  0xf5   : > { %4123 = vmatprep.mubr.msk.bf16.mxu0 %vm705_vm3, %v5024_v17  ;;  %v5318_v47 = vpop.f32.mrf.mxu1 }
  0xf6   : > { %v5338_v59 = vpop.f32.mrf.mxu0 }
  0xf7   : > { %4086 = vmatmul.mubr.msk.bf16.gmra.mxu1 %vm705_vm3, %v4993_v10  ;;  %v5324_v33 = vpop.f32.mrf.mxu1 }
  0xf8   : > { %4089 = vmatprep.mubr.msk.bf16.mxu1 %vm705_vm3, %v5028_v30 }
  0xf9   : > { %v5334_v17 = vpop.f32.mrf.mxu1 }
  0xfb   : > { %v5340_v4 = vpop.f32.mrf.mxu1 }
  0xfc   : > { %4124 = vmatmul.mubr.msk.bf16.gmra.mxu0 %vm705_vm3, %v5132_v20 }
  0xfd   : > { %4127 = vmatprep.mubr.msk.bf16.mxu0 %vm705_vm3, %v5138_v48 }
  0xff   : > { %4090 = vmatmul.mubr.msk.bf16.gmra.mxu1 %vm705_vm3, %v5030_v1 }
 0x100   : > { %4093 = vmatprep.mubr.msk.bf16.mxu1 %vm705_vm3, %v5116_v23 }
 0x101   : > { %v5344_v20 = vpop.f32.mrf.mxu0 }
 0x103   : > { %v5354_v55 = vpop.f32.mrf.mxu0 }
 0x104   : > { %4128 = vmatmul.mubr.msk.bf16.gmra.mxu0 %vm705_vm3, %v5160_v39 }
 0x105   : > { %4131 = vmatprep.mubr.msk.bf16.mxu0 %vm705_vm3, %v5166_v22  ;;  %v5350_v48 = vpop.f32.mrf.mxu1  ;;  %v5360_v39 = vpop.f32.mrf.mxu0 }
 0x107   : > { %4094 = vmatmul.mubr.msk.bf16.gmra.mxu1 %vm705_vm3, %v5121_v8  ;;  %v5356_v45 = vpop.f32.mrf.mxu1  ;;  %v5370_v44 = vpop.f32.mrf.mxu0 }
 0x108   : > { %4097 = vmatprep.mubr.msk.bf16.mxu1 %vm705_vm3, %v5154_v13 }
 0x109   : > { %v5366_v22 = vpop.f32.mrf.mxu1 }
 0x10b   : > { %v5372_v49 = vpop.f32.mrf.mxu1 }
 0x10c   : > { %4132 = vmatmul.mubr.msk.bf16.gmra.mxu0 %vm705_vm3, %v5035_v18 }
 0x10d   : > { %4135 = vmatprep.mubr.msk.bf16.mxu0 %vm705_vm3, %v5048_v6 }
 0x10f   : > { %4098 = vmatmul.mubr.msk.bf16.gmra.mxu1 %vm705_vm3, %v5156_v16 }
 0x110   : > { %4101 = vmatprep.mubr.msk.bf16.mxu1 %vm705_vm3, %v5071_v21 }
 0x112   : > { %v5376_v18 = vpop.f32.mrf.mxu0 }
 0x114   : > { %4136 = vmatmul.mubr.msk.bf16.gmra.mxu0 %vm705_vm3, %v5062_v43  ;;  %v5386_v29 = vpop.f32.mrf.mxu0 }
 0x115   : > { %4139 = vmatprep.mubr.msk.bf16.mxu0 %vm705_vm3, %v5077_v28  ;;  %v5396_v28 = vld [vmem:[%s4514_s11 + $0xcc] sm:$0xf] }
 0x116   : > { %v5392_v43 = vpop.f32.mrf.mxu0 }
 0x117   : > { %4102 = vmatmul.mubr.msk.bf16.gmra.mxu1 %vm705_vm3, %v5086_v50  ;;  %v5382_v6 = vpop.f32.mrf.mxu1 }
 0x118   : > { %6143 = vst [vmem:[#allocation27_spill] sm:$0xff] %v5382_v6  ;;  %4105 = vmatprep.mubr.msk.bf16.mxu1 %vm705_vm3, %v5108_v52  ;;  %v5405_v31 = vpop.f32.mrf.mxu0 }
 0x119   : > { %v5388_v24 = vpop.f32.mrf.mxu1 }
 0x11a   : > { %6144 = vst [vmem:[#allocation25_spill] sm:$0xff] %v5388_v24 }
 0x11b   : > { %v5403_v38 = vpop.f32.mrf.mxu1 }
 0x11c   : > { %4140 = vmatmul.mubr.msk.bf16.gmra.mxu0 %vm705_vm3, %v5092_v9  ;;  %6145 = vst [vmem:[#allocation28_spill] sm:$0xff] %v5403_v38  ;;  %v3535_v9 = vcombine.low %v5396_v28, %v5399_v61 }
 0x11d   : > { %4143 = vmatprep.mubr.msk.bf16.mxu0 %vm705_vm3, %v3480_v3  ;;  %v5411_v27 = vpop.f32.mrf.mxu1 }
 0x11e   : > { %6146 = vst [vmem:[#allocation30_spill] sm:$0xff] %v5411_v27 }
 0x11f   : > { %4106 = vmatmul.mubr.msk.bf16.gmra.mxu1 %vm705_vm3, %v5119_v58 }
 0x120   : > { %4109 = vmatprep.mubr.msk.bf16.mxu1 %vm705_vm3, %v5128_v2 }
 0x124   : > { %v5413_v25 = vpop.f32.mrf.mxu0  ;;  %4144 = vmatmul.mubr.msk.bf16.gmra.mxu0 %vm705_vm3, %v3535_v9 }
 0x125   : > { %4183 = vmatprep.mubr.msk.bf16.mxu0 %vm705_vm3, %v4951_v37 }
 0x126   : > { %v5418_v41 = vpop.f32.mrf.mxu0 }
 0x127   : > { %v5420_v3 = vpop.f32.mrf.mxu1  ;;  %4110 = vmatmul.mubr.msk.bf16.gmra.mxu1 %vm705_vm3, %v5207_v11 }
 0x128   : > { %6147 = vst [vmem:[#allocation15_spill] sm:$0xff] %v5420_v3  ;;  %v5424_v51 = vpop.f32.mrf.mxu0  ;;  %4149 = vmatprep.mubr.msk.bf16.mxu1 %vm705_vm3, %v6131_v34 }
 0x129   : > { %v5428_v62 = vpop.f32.mrf.mxu1 }
 0x12a   : > { %6148 = vst [vmem:[#allocation10_spill] sm:$0xff] %v5428_v62  ;;  %v5430_v27 = vpop.f32.mrf.mxu0 }
 0x12b   : > { %v5432_v9 = vpop.f32.mrf.mxu1 }
 0x12c   : > { %6149 = vst [vmem:[#allocation11_spill] sm:$0xff] %v5432_v9  ;;  %v3981_v38 = vpop.f32.mrf.mxu0  ;;  %4184 = vmatmul.mubr.msk.bf16.vlgmr.msra.gmra.mxu0 %vm705_vm3, %v4991_v14 }
 0x12d   : > { %v5436_v37 = vpop.f32.mrf.mxu1  ;;  %4187 = vmatprep.mubr.msk.bf16.mxu0 %vm705_vm3, %v4993_v10 }
 0x12e   : > { %6150 = vst [vmem:[#allocation13_spill] sm:$0xff] %v5436_v37  ;;  %v1477_v3 = vpop.f32.mrf.mxu0 }
 0x12f   : > { %v3947_v24 = vpop.f32.mrf.mxu1  ;;  %4150 = vmatmul.mubr.msk.bf16.vlgmr.msra.gmra.mxu1 %vm705_vm3, %v6132_v42 }
 0x130   : > { %v1093_v34 = vadd.f32 %v3947_v24, %v5312_v63  ;;  %v3982_v62 = vpop.f32.mrf.mxu0  ;;  %4153 = vmatprep.mubr.msk.bf16.mxu1 %vm705_vm3, %v6133_v46 }
 0x131   : > { %v1084_v9 = vpop.f32.mrf.mxu1 }
 0x132   : > { %v5445_v54 = vadd.f32 %v3981_v38, %v1093_v34  ;;  %v1085_v14 = vadd.f32 %v1084_v9, %v5322_v53  ;;  %v1480_v37 = vpop.f32.mrf.mxu0 }
 0x133   : > { %v3948_v6 = vpop.f32.mrf.mxu1 }
 0x134   : > { %v5448_v32 = vadd.f32 %v1477_v3, %v1085_v14  ;;  %v1096_v10 = vadd.f32 %v3948_v6, %v5328_v56  ;;  %v3985_v12 = vpop.f32.mrf.mxu0  ;;  %4188 = vmatmul.mubr.msk.bf16.gmra.mxu0 %vm705_vm3, %v5028_v30 }
 0x135   : > { %v1087_v42 = vpop.f32.mrf.mxu1  ;;  %4191 = vmatprep.mubr.msk.bf16.mxu0 %vm705_vm3, %v5030_v1 }
 0x136   : > { %v5455_v46 = vadd.f32 %v3982_v62, %v1096_v10  ;;  %v1088_v63 = vadd.f32 %v1087_v42, %v5338_v59  ;;  %v1493_v24 = vpop.f32.mrf.mxu0 }
 0x137   : > { %v3951_v53 = vpop.f32.mrf.mxu1  ;;  %4154 = vmatmul.mubr.msk.bf16.gmra.mxu1 %vm705_vm3, %v6134_v19 }
 0x138   : > { %v5460_v38 = vadd.f32 %v1480_v37, %v1088_v63  ;;  %v1109_v56 = vadd.f32 %v3951_v53, %v5344_v20  ;;  %v3986_v6 = vpop.f32.mrf.mxu0  ;;  %4157 = vmatprep.mubr.msk.bf16.mxu1 %vm705_vm3, %v6135_v36 }
 0x139   : > { %v1100_v30 = vpop.f32.mrf.mxu1 }
 0x13a   : > { %v5465_v3 = vadd.f32 %v3985_v12, %v1109_v56  ;;  %v1101_v1 = vadd.f32 %v1100_v30, %v5354_v55  ;;  %v1496_v62 = vpop.f32.mrf.mxu0 }
 0x13b   : > { %v3952_v59 = vpop.f32.mrf.mxu1 }
 0x13c   : > { %v5468_v9 = vadd.f32 %v1493_v24, %v1101_v1  ;;  %v1112_v34 = vadd.f32 %v3952_v59, %v5360_v39  ;;  %v3989_v19 = vpop.f32.mrf.mxu0  ;;  %4192 = vmatmul.mubr.msk.bf16.gmra.mxu0 %vm705_vm3, %v5116_v23 }
 0x13d   : > { %v1103_v20 = vpop.f32.mrf.mxu1  ;;  %4195 = vmatprep.mubr.msk.bf16.mxu0 %vm705_vm3, %v5121_v8 }
 0x13e   : > { %v5475_v36 = vadd.f32 %v3986_v6, %v1112_v34  ;;  %v1104_v12 = vadd.f32 %v1103_v20, %v5370_v44  ;;  %v1509_v37 = vpop.f32.mrf.mxu0 }
 0x13f   : > { %v3955_v55 = vpop.f32.mrf.mxu1  ;;  %4158 = vmatmul.mubr.msk.bf16.gmra.mxu1 %vm705_vm3, %v4903_v15 }
 0x140   : > { %v5480_v14 = vadd.f32 %v1496_v62, %v1104_v12  ;;  %v1125_v39 = vadd.f32 %v3955_v55, %v5376_v18  ;;  %v3990_v10 = vpop.f32.mrf.mxu0  ;;  %4161 = vmatprep.mubr.msk.bf16.mxu1 %vm705_vm3, %v6136_v26 }
 0x141   : > { %v1116_v23 = vpop.f32.mrf.mxu1 }
 0x142   : > { %v5485_v42 = vadd.f32 %v3989_v19, %v1125_v39  ;;  %v1117_v8 = vadd.f32 %v1116_v23, %v5386_v29  ;;  %v1512_v63 = vpop.f32.mrf.mxu0 }
 0x143   : > { %v3956_v44 = vpop.f32.mrf.mxu1 }
 0x144   : > { %v5488_v24 = vadd.f32 %v1509_v37, %v1117_v8  ;;  %v1128_v53 = vadd.f32 %v3956_v44, %v5392_v43  ;;  %v3993_v15 = vpop.f32.mrf.mxu0  ;;  %4196 = vmatmul.mubr.msk.bf16.gmra.mxu0 %vm705_vm3, %v5154_v13  ;;  %v2492_v37 = vshll.u32 %v5396_v28, 16 }
 0x145   : > { %v1119_v18 = vpop.f32.mrf.mxu1  ;;  %4199 = vmatprep.mubr.msk.bf16.mxu0 %vm705_vm3, %v5156_v16 }
 0x146   : > { %v5495_v26 = vadd.f32 %v3990_v10, %v1128_v53  ;;  %v1120_v56 = vadd.f32 %v1119_v18, %v5405_v31  ;;  %v1525_v6 = vpop.f32.mrf.mxu0  ;;  %v2494_v44 = vrot.slane %v2492_v37, 5 }
 0x147   : > { %v3959_v29 = vpop.f32.mrf.mxu1  ;;  %4162 = vmatmul.mubr.msk.bf16.gmra.mxu1 %vm705_vm3, %v6137_v0 }
 0x148   : > { %v5500_v30 = vadd.f32 %v1512_v63, %v1120_v56  ;;  %v1141_v43 = vadd.f32 %v3959_v29, %v5413_v25  ;;  %v3994_v1 = vpop.f32.mrf.mxu0  ;;  %4165 = vmatprep.mubr.msk.bf16.mxu1 %vm705_vm3, %v6138_v35 }
 0x149   : > { %v1132_v13 = vpop.f32.mrf.mxu1 }
 0x14a   : > { %v5505_v62 = vadd.f32 %v3993_v15, %v1141_v43  ;;  %v1133_v16 = vadd.f32 %v1132_v13, %v5418_v41  ;;  %v1528_v59 = vpop.f32.mrf.mxu0  ;;  %v2489_v41 = vshrl.u32 %v5396_v28, 16 }
 0x14b   : > { %v3960_v31 = vpop.f32.mrf.mxu1 }
 0x14c   : > { %v5508_v34 = vadd.f32 %v1525_v6, %v1133_v16  ;;  %v1144_v19 = vadd.f32 %v3960_v31, %v5424_v51  ;;  %v3997_v0 = vpop.f32.mrf.mxu0  ;;  %4200 = vmatmul.mubr.msk.bf16.gmra.mxu0 %vm705_vm3, %v5071_v21  ;;  %v2498_v51 = vshll.u32 %v5399_v61, 16  ;;  %v2502_v21 = vshrl.u32 %v5399_v61, 16 }
 0x14d   : > { %v1135_v25 = vpop.f32.mrf.mxu1  ;;  %4203 = vmatprep.mubr.msk.bf16.mxu0 %vm705_vm3, %v5086_v50 }
 0x14e   : > { %v5515_v35 = vadd.f32 %v3994_v1, %v1144_v19  ;;  %v1136_v20 = vadd.f32 %v1135_v25, %v5430_v27  ;;  %v1541_v12 = vpop.f32.mrf.mxu0  ;;  %v2500_v15 = vrot.slane %v2498_v51, 5  ;;  %v2504_v18 = vrot.slane %v2502_v21, 4 }
 0x14f   : > { %v3963_v55 = vpop.f32.mrf.mxu1  ;;  %4166 = vmatmul.mubr.msk.bf16.gmra.mxu1 %vm705_vm3, %v6139_v40  ;;  %v2491_v40 = vrot.slane %v2489_v41, 4  ;;  %v3570_v19 = vrot.slane %v5396_v28, 9 }
 0x150   : > { %v5524_v39 = vadd.f32 %v1528_v59, %v1136_v20  ;;  %v1157_v50 = vadd.f32 %v3963_v55, %v5318_v47  ;;  %v3998_v10 = vpop.f32.mrf.mxu0  ;;  %4169 = vmatprep.mubr.msk.bf16.mxu1 %vm705_vm3, %v6140_v57  ;;  %v2719_v57 = vrot.slane %v5399_v61, 5 }
 0x151   : > { %v1148_v27 = vpop.f32.mrf.mxu1 }
 0x152   : > { %v5529_v23 = vadd.f32 %v3997_v0, %v1157_v50  ;;  %v1149_v8 = vadd.f32 %v1148_v27, %v5324_v33  ;;  %v1544_v63 = vpop.f32.mrf.mxu0  ;;  %v266_v33 = vld [vmem:[%s4514_s11 + $0xd4] sm:$0x1]  ;;  %s3660_s11 = sshll.u32 %s4466_s19, 11 }
 0x153   : > { %v3964_v53 = vpop.f32.mrf.mxu1  ;;  %v2508_v31 = vshll.u32 %v266_v33, 16  ;;  %v2722_v25 = vrot.slane %v266_v33, 5  ;;  %s5923_s22 = scalar_lea.hbm %s6039_s2, %s3660_s11 }
 0x154   : > { %v5532_v56 = vadd.f32 %v1541_v12, %v1149_v8  ;;  %v1160_v47 = vadd.f32 %v3964_v53, %v5334_v17  ;;  %v4001_v6 = vpop.f32.mrf.mxu0  ;;  %4204 = vmatmul.mubr.msk.bf16.gmra.mxu0 %vm705_vm3, %v5108_v52  ;;  %v2495_v17 = vor.u32 %v2494_v44, %v2491_v40 }
 0x155   : > { %v1151_v29 = vpop.f32.mrf.mxu1  ;;  %4207 = vmatprep.mubr.msk.bf16.mxu0 %vm705_vm3, %v5119_v58  ;;  %v2505_v58 = vor.u32 %v2504_v18, %v2500_v15  ;;  %v2510_v28 = vrot.slane %v2508_v31, 5 }
 0x156   : > { %v5541_v43 = vadd.f32 %v3998_v10, %v1160_v47  ;;  %v1152_v1 = vadd.f32 %v1151_v29, %v5340_v4  ;;  %v1557_v13 = vpop.f32.mrf.mxu0  ;;  %v2721_v4 = vrot.slane %v2719_v57, 4  ;;  %v2496_v37 = vrot.slane %v2495_v17, 4  ;;  %v6154_v47 = vld [vmem:[#allocation23_spill] sm:$0xff]  ;;  %v6155_v29 = vld [vmem:[#allocation25_spill] sm:$0xff]  ;;  %v6156_v17 = vld [vmem:[#allocation28_spill] sm:$0xff] }
 0x157   : > { %v3967_v16 = vpop.f32.mrf.mxu1  ;;  %4170 = vmatmul.mubr.msk.bf16.gmra.mxu1 %vm705_vm3, %v6141_v7 }
 0x158   : > { %v5546_v59 = vadd.f32 %v1544_v63, %v1152_v1  ;;  %v1173_v52 = vadd.f32 %v3967_v16, %v5350_v48  ;;  %v4002_v61 = vpop.f32.mrf.mxu0  ;;  %4173 = vmatprep.mubr.msk.bf16.mxu1 %vm705_vm3, %v4877_v5  ;;  %v2506_v5 = vrot.slane %v2505_v58, 4  ;;  %v2723_v50 = vsel %vm4882_vm7, %v2721_v4, %v2722_v25  ;;  %v6151_v63 = vld [vmem:[#allocation32_spill] sm:$0xff] }
 0x159   : > { %v1164_v0 = vpop.f32.mrf.mxu1  ;;  %v2501_v40 = vsel %vm4559_vm4, %v2496_v37, %v2500_v15 }
 0x15a   : > { %v5552_v20 = vadd.f32 %v4001_v6, %v1173_v52  ;;  %v1165_v7 = vadd.f32 %v1164_v0, %v5356_v45  ;;  %v1560_v12 = vpop.f32.mrf.mxu0  ;;  %v2720_v45 = vsel %vm4882_vm7, %v3570_v19, %v2719_v57  ;;  %v2511_v60 = vsel %vm4559_vm4, %v2506_v5, %v2510_v28  ;;  %v6157_v19 = vld [vmem:[#allocation30_spill] sm:$0xff] }
 0x15b   : > { %v3968_v41 = vpop.f32.mrf.mxu1  ;;  %v3553_v15 = vcombine.low %v2501_v40, %v2511_v60  ;;  %v6159_v5 = vld [vmem:[#allocation10_spill] sm:$0xff]  ;;  %v6161_v40 = vld [vmem:[#allocation13_spill] sm:$0xff] }
 0x15c   : > { %v5555_v55 = vadd.f32 %v1557_v13, %v1165_v7  ;;  %v1176_v48 = vadd.f32 %v3968_v41, %v5366_v22  ;;  %v4005_v51 = vpop.f32.mrf.mxu0  ;;  %4208 = vmatmul.mubr.msk.bf16.gmra.mxu0 %vm705_vm3, %v5128_v2 }
 0x15d   : > { %v1167_v21 = vpop.f32.mrf.mxu1  ;;  %4211 = vmatprep.mubr.msk.bf16.mxu0 %vm705_vm3, %v5207_v11  ;;  %v6153_v11 = vld [vmem:[#allocation27_spill] sm:$0xff] }
 0x15e   : > { %v5566_v10 = vadd.f32 %v4002_v61, %v1176_v48  ;;  %v1168_v22 = vadd.f32 %v1167_v21, %v5372_v49  ;;  %v1573_v27 = vpop.f32.mrf.mxu0  ;;  %v3572_v49 = vcombine.low %v2720_v45, %v2723_v50 }
 0x15f   : > { %v3971_v8 = vpop.f32.mrf.mxu1  ;;  %4174 = vmatmul.mubr.msk.bf16.gmra.mxu1 %vm705_vm3, %v6151_v63 }
 0x160   : > { %v5573_v44 = vadd.f32 %v1560_v12, %v1168_v22  ;;  %v1189_v53 = vadd.f32 %v3971_v8, %v6153_v11  ;;  %v4006_v18 = vpop.f32.mrf.mxu0  ;;  %4177 = vmatprep.mubr.msk.bf16.mxu1 %vm705_vm3, %v6154_v47  ;;  %v6158_v12 = vld [vmem:[#allocation15_spill] sm:$0xff] }
 0x161   : > { %v1180_v6 = vpop.f32.mrf.mxu1  ;;  %v6160_v22 = vld [vmem:[#allocation11_spill] sm:$0xff] }
 0x162   : > { %v5580_v57 = vadd.f32 %v4005_v51, %v1189_v53  ;;  %v1181_v33 = vadd.f32 %v1180_v6, %v6155_v29  ;;  %v1576_v1 = vpop.f32.mrf.mxu0 }
 0x163   : > { %v3972_v13 = vpop.f32.mrf.mxu1 }
 0x164   : > { %v5583_v16 = vadd.f32 %v1573_v27, %v1181_v33  ;;  %v1192_v52 = vadd.f32 %v3972_v13, %v6156_v17  ;;  %v4009_v61 = vpop.f32.mrf.mxu0  ;;  %4212 = vmatmul.mubr.msk.bf16.gmra.mxu0 %vm705_vm3, %v3572_v49 }
 0x165   : > { %v1183_v58 = vpop.f32.mrf.mxu1 }
 0x166   : > { %v5587_v31 = vadd.f32 %v4006_v18, %v1192_v52  ;;  %v1184_v0 = vadd.f32 %v1183_v58, %v6157_v19  ;;  %v1589_v4 = vpop.f32.mrf.mxu0 }
 0x167   : > { %v3975_v25 = vpop.f32.mrf.mxu1  ;;  %4178 = vmatmul.mubr.msk.bf16.gmra.mxu1 %vm705_vm3, %v3553_v15 }
 0x168   : > { %v5591_v7 = vadd.f32 %v1576_v1, %v1184_v0  ;;  %v1205_v41 = vadd.f32 %v3975_v25, %v6158_v12  ;;  %v4010_v37 = vpop.f32.mrf.mxu0 }
 0x169   : > { %v1196_v48 = vpop.f32.mrf.mxu1 }
 0x16a   : > { %v5594_v51 = vadd.f32 %v4009_v61, %v1205_v41  ;;  %v1197_v28 = vadd.f32 %v1196_v48, %v6159_v5  ;;  %v1592_v21 = vpop.f32.mrf.mxu0 }
 0x16b   : > { %v3976_v45 = vpop.f32.mrf.mxu1 }
 0x16c   : > { %v5597_v50 = vadd.f32 %v1589_v4, %v1197_v28  ;;  %v1208_v27 = vadd.f32 %v3976_v45, %v6160_v22  ;;  %v4049_v8 = vpop.f32.mrf.mxu0 }
 0x16d   : > { %v1199_v63 = vpop.f32.mrf.mxu1 }
 0x16e   : > { %v5600_v2 = vadd.f32 %v4010_v37, %v1208_v27  ;;  %v1200_v11 = vadd.f32 %v1199_v63, %v6161_v40  ;;  %v1911_v53 = vpop.f32.mrf.mxu0 }
 0x16f   : > { %v4015_v18 = vpop.f32.mrf.mxu1 }
 0x170   : > { %v5603_v47 = vadd.f32 %v1592_v21, %v1200_v11  ;;  %v1812_v60 = vadd.f32 %v4015_v18, %v5445_v54  ;;  %v4050_v49 = vpop.f32.mrf.mxu0 }
 0x171   : > { %v1683_v6 = vpop.f32.mrf.mxu1 }
 0x172   : > { %v5606_v29 = vadd.f32 %v4049_v8, %v1812_v60  ;;  %v1810_v33 = vadd.f32 %v1683_v6, %v5448_v32  ;;  %v1914_v1 = vpop.f32.mrf.mxu0 }
 0x173   : > { %v4016_v13 = vpop.f32.mrf.mxu1 }
 0x174   : > { %v5609_v15 = vadd.f32 %v1911_v53, %v1810_v33  ;;  %v1813_v17 = vadd.f32 %v4016_v13, %v5455_v46  ;;  %v4053_v52 = vpop.f32.mrf.mxu0 }
 0x175   : > { %v1686_v61 = vpop.f32.mrf.mxu1 }
 0x176   : > { %v5612_v58 = vadd.f32 %v4050_v49, %v1813_v17  ;;  %v1811_v19 = vadd.f32 %v1686_v61, %v5460_v38  ;;  %v1927_v0 = vpop.f32.mrf.mxu0 }
 0x177   : > { %v4019_v54 = vpop.f32.mrf.mxu1 }
 0x178   : > { %v5615_v4 = vadd.f32 %v1914_v1, %v1811_v19  ;;  %v1816_v25 = vadd.f32 %v4019_v54, %v5465_v3  ;;  %v4054_v12 = vpop.f32.mrf.mxu0 }
 0x179   : > { %v1699_v32 = vpop.f32.mrf.mxu1 }
 0x17a   : > { %v5618_v41 = vadd.f32 %v4053_v52, %v1816_v25  ;;  %v1814_v37 = vadd.f32 %v1699_v32, %v5468_v9  ;;  %v1930_v48 = vpop.f32.mrf.mxu0 }
 0x17b   : > { %v4020_v46 = vpop.f32.mrf.mxu1 }
 0x17c   : > { %v5621_v5 = vadd.f32 %v1927_v0, %v1814_v37  ;;  %v1817_v28 = vadd.f32 %v4020_v46, %v5475_v36  ;;  %v4057_v21 = vpop.f32.mrf.mxu0 }
 0x17d   : > { %v1702_v38 = vpop.f32.mrf.mxu1 }
 0x17e   : > { %v5624_v45 = vadd.f32 %v4054_v12, %v1817_v28  ;;  %v1815_v22 = vadd.f32 %v1702_v38, %v5480_v14  ;;  %v1943_v27 = vpop.f32.mrf.mxu0 }
 0x17f   : > { %v4023_v3 = vpop.f32.mrf.mxu1 }
 0x180   : > { %v5627_v8 = vadd.f32 %v1930_v48, %v1815_v22  ;;  %v1820_v63 = vadd.f32 %v4023_v3, %v5485_v42  ;;  %v4058_v40 = vpop.f32.mrf.mxu0 }
 0x181   : > { %v1715_v9 = vpop.f32.mrf.mxu1 }
 0x182   : > { %v5630_v11 = vadd.f32 %v4057_v21, %v1820_v63  ;;  %v1818_v53 = vadd.f32 %v1715_v9, %v5488_v24  ;;  %v1946_v18 = vpop.f32.mrf.mxu0 }
 0x183   : > { %v4024_v36 = vpop.f32.mrf.mxu1 }
 0x184   : > { %v5633_v60 = vadd.f32 %v1943_v27, %v1818_v53  ;;  %v1821_v49 = vadd.f32 %v4024_v36, %v5495_v26  ;;  %v4061_v6 = vpop.f32.mrf.mxu0 }
 0x185   : > { %v1718_v14 = vpop.f32.mrf.mxu1 }
 0x186   : > { %v5636_v33 = vadd.f32 %v4058_v40, %v1821_v49  ;;  %v1819_v1 = vadd.f32 %v1718_v14, %v5500_v30  ;;  %v1959_v13 = vpop.f32.mrf.mxu0 }
 0x187   : > { %v4027_v42 = vpop.f32.mrf.mxu1 }
 0x188   : > { %v5639_v17 = vadd.f32 %v1946_v18, %v1819_v1  ;;  %v1824_v52 = vadd.f32 %v4027_v42, %v5505_v62  ;;  %v4062_v61 = vpop.f32.mrf.mxu0 }
 0x189   : > { %v1731_v24 = vpop.f32.mrf.mxu1 }
 0x18a   : > { %v5642_v19 = vadd.f32 %v4061_v6, %v1824_v52  ;;  %v1822_v0 = vadd.f32 %v1731_v24, %v5508_v34  ;;  %v1962_v54 = vpop.f32.mrf.mxu0 }
 0x18b   : > { %v4028_v26 = vpop.f32.mrf.mxu1 }
 0x18c   : > { %v5645_v25 = vadd.f32 %v1959_v13, %v1822_v0  ;;  %v1825_v12 = vadd.f32 %v4028_v26, %v5515_v35  ;;  %v4065_v32 = vpop.f32.mrf.mxu0 }
 0x18d   : > { %v1734_v30 = vpop.f32.mrf.mxu1 }
 0x18e   : > { %v5648_v37 = vadd.f32 %v4062_v61, %v1825_v12  ;;  %v1823_v48 = vadd.f32 %v1734_v30, %v5524_v39  ;;  %v1975_v46 = vpop.f32.mrf.mxu0 }
 0x18f   : > { %v4031_v62 = vpop.f32.mrf.mxu1 }
 0x190   : > { %v5651_v28 = vadd.f32 %v1962_v54, %v1823_v48  ;;  %v1828_v21 = vadd.f32 %v4031_v62, %v5529_v23  ;;  %v4066_v38 = vpop.f32.mrf.mxu0 }
 0x191   : > { %v1747_v34 = vpop.f32.mrf.mxu1 }
 0x192   : > { %v5654_v22 = vadd.f32 %v4065_v32, %v1828_v21  ;;  %v1826_v27 = vadd.f32 %v1747_v34, %v5532_v56  ;;  %v1978_v3 = vpop.f32.mrf.mxu0 }
 0x193   : > { %v4032_v35 = vpop.f32.mrf.mxu1 }
 0x194   : > { %v5657_v63 = vadd.f32 %v1975_v46, %v1826_v27  ;;  %v1829_v40 = vadd.f32 %v4032_v35, %v5541_v43  ;;  %v4069_v9 = vpop.f32.mrf.mxu0 }
 0x195   : > { %v1750_v39 = vpop.f32.mrf.mxu1 }
 0x196   : > { %v5660_v53 = vadd.f32 %v4066_v38, %v1829_v40  ;;  %v1827_v18 = vadd.f32 %v1750_v39, %v5546_v59  ;;  %v1991_v36 = vpop.f32.mrf.mxu0 }
 0x197   : > { %v4035_v23 = vpop.f32.mrf.mxu1 }
 0x198   : > { %v5663_v49 = vadd.f32 %v1978_v3, %v1827_v18  ;;  %v1832_v6 = vadd.f32 %v4035_v23, %v5552_v20  ;;  %v4070_v14 = vpop.f32.mrf.mxu0 }
 0x199   : > { %v1763_v56 = vpop.f32.mrf.mxu1 }
 0x19a   : > { %v5666_v1 = vadd.f32 %v4069_v9, %v1832_v6  ;;  %v1830_v13 = vadd.f32 %v1763_v56, %v5555_v55  ;;  %v1994_v42 = vpop.f32.mrf.mxu0 }
 0x19b   : > { %v4036_v43 = vpop.f32.mrf.mxu1 }
 0x19c   : > { %v5669_v52 = vadd.f32 %v1991_v36, %v1830_v13  ;;  %v1833_v61 = vadd.f32 %v4036_v43, %v5566_v10  ;;  %v4073_v24 = vpop.f32.mrf.mxu0 }
 0x19d   : > { %v1766_v59 = vpop.f32.mrf.mxu1 }
 0x19e   : > { %6162 = vst [vmem:[#allocation16_spill] sm:$0xff] %v5669_v52  ;;  %v5672_v0 = vadd.f32 %v4070_v14, %v1833_v61  ;;  %v1831_v54 = vadd.f32 %v1766_v59, %v5573_v44  ;;  %v2007_v26 = vpop.f32.mrf.mxu0 }
 0x19f   : > { %v4039_v20 = vpop.f32.mrf.mxu1 }
 0x1a0   : > { %6163 = vst [vmem:[#allocation14_spill] sm:$0xff] %v5672_v0  ;;  %v5675_v12 = vadd.f32 %v1994_v42, %v1831_v54  ;;  %v1836_v32 = vadd.f32 %v4039_v20, %v5580_v57  ;;  %v4074_v30 = vpop.f32.mrf.mxu0 }
 0x1a1   : > { %v1779_v55 = vpop.f32.mrf.mxu1 }
 0x1a2   : > { %6164 = vst [vmem:[#allocation18_spill] sm:$0xff] %v5675_v12  ;;  %v5678_v48 = vadd.f32 %v4073_v24, %v1836_v32  ;;  %v1834_v46 = vadd.f32 %v1779_v55, %v5583_v16  ;;  %v2010_v62 = vpop.f32.mrf.mxu0 }
 0x1a3   : > { %v4040_v10 = vpop.f32.mrf.mxu1 }
 0x1a4   : > { %v5681_v21 = vadd.f32 %v2007_v26, %v1834_v46  ;;  %v1837_v38 = vadd.f32 %v4040_v10, %v5587_v31  ;;  %v4077_v34 = vpop.f32.mrf.mxu0 }
 0x1a5   : > { %v1782_v44 = vpop.f32.mrf.mxu1 }
 0x1a6   : > { %6165 = vst [vmem:[#allocation20_spill] sm:$0xff] %v5681_v21  ;;  %v5684_v27 = vadd.f32 %v4074_v30, %v1837_v38  ;;  %v1835_v3 = vadd.f32 %v1782_v44, %v5591_v7  ;;  %v2023_v35 = vpop.f32.mrf.mxu0 }
 0x1a7   : > { %v4043_v57 = vpop.f32.mrf.mxu1 }
 0x1a8   : > { %6166 = vst [vmem:[#allocation22_spill] sm:$0xff] %v5684_v27  ;;  %v5687_v40 = vadd.f32 %v2010_v62, %v1835_v3  ;;  %v1840_v9 = vadd.f32 %v4043_v57, %v5594_v51  ;;  %v4078_v39 = vpop.f32.mrf.mxu0 }
 0x1a9   : > { %v1795_v16 = vpop.f32.mrf.mxu1 }
 0x1aa   : > { %6167 = vst [vmem:[#allocation26_spill] sm:$0xff] %v5687_v40  ;;  %v5690_v18 = vadd.f32 %v4077_v34, %v1840_v9  ;;  %v1838_v36 = vadd.f32 %v1795_v16, %v5597_v50  ;;  %v2026_v23 = vpop.f32.mrf.mxu0 }
 0x1ab   : > { %v4044_v31 = vpop.f32.mrf.mxu1 }
 0x1ac   : > { %v5693_v6 = vadd.f32 %v2023_v35, %v1838_v36  ;;  %v1841_v14 = vadd.f32 %v4044_v31, %v5600_v2  ;;  %v4117_v56 = vpop.f32.mrf.mxu0 }
 0x1ad   : > { %v1798_v7 = vpop.f32.mrf.mxu1 }
 0x1ae   : > { %6168 = vst [vmem:[#allocation31_spill] sm:$0xff] %v5693_v6  ;;  %v5696_v13 = vadd.f32 %v4078_v39, %v1841_v14  ;;  %v1839_v42 = vadd.f32 %v1798_v7, %v5603_v47  ;;  %v2329_v43 = vpop.f32.mrf.mxu0 }
 0x1af   : > { %v4083_v51 = vpop.f32.mrf.mxu1 }
 0x1b0   : > { %6169 = vst [vmem:[#allocation12_spill] sm:$0xff] %v5696_v13  ;;  %v5699_v61 = vadd.f32 %v2026_v23, %v1839_v42  ;;  %v2252_v24 = vadd.f32 %v4083_v51, %v5606_v29  ;;  %v5702_v59 = vpop.f32.mrf.mxu0 }
 0x1b1   : > { %v2123_v50 = vpop.f32.mrf.mxu1 }
 0x1b2   : > { %6170 = vst [vmem:[#allocation17_spill] sm:$0xff] %v5699_v61  ;;  %v5704_v54 = vadd.f32 %v4117_v56, %v2252_v24  ;;  %v2250_v26 = vadd.f32 %v2123_v50, %v5609_v15  ;;  %v5707_v2 = vpop.f32.mrf.mxu0 }
 0x1b3   : > { %v5709_v20 = vpop.f32.mrf.mxu1 }
 0x1b4   : > { %v5711_v32 = vadd.f32 %v2329_v43, %v2250_v26  ;;  %v4121_v47 = vpop.f32.mrf.mxu0 }
 0x1b5   : > { %v5713_v30 = vpop.f32.mrf.mxu1 }
 0x1b6   : > { %v5715_v55 = vpop.f32.mrf.mxu0 }
 0x1b7   : > { %v4087_v46 = vpop.f32.mrf.mxu1 }
 0x1b8   : > { %v2256_v29 = vadd.f32 %v4087_v46, %v5618_v41  ;;  %v5718_v62 = vpop.f32.mrf.mxu0 }
 0x1b9   : > { %v5720_v10 = vpop.f32.mrf.mxu1 }
 0x1ba   : > { %v5722_v38 = vadd.f32 %v4121_v47, %v2256_v29  ;;  %v5724_v15 = vpop.f32.mrf.mxu0 }
 0x1bb   : > { %v5726_v34 = vpop.f32.mrf.mxu1 }
 0x1bc   : > { %v4125_v44 = vpop.f32.mrf.mxu0 }
 0x1bd   : > { %v5728_v3 = vpop.f32.mrf.mxu1 }
 0x1be   : > { %v5730_v35 = vpop.f32.mrf.mxu0 }
 0x1bf   : > { %v4091_v57 = vpop.f32.mrf.mxu1 }
 0x1c0   : > { %v2260_v9 = vadd.f32 %v4091_v57, %v5630_v11  ;;  %v5733_v39 = vpop.f32.mrf.mxu0 }
 0x1c1   : > { %v5735_v41 = vpop.f32.mrf.mxu1 }
 0x1c2   : > { %v5737_v16 = vadd.f32 %v4125_v44, %v2260_v9  ;;  %v5739_v36 = vpop.f32.mrf.mxu0 }
 0x1c3   : > { %v5741_v23 = vpop.f32.mrf.mxu1 }
 0x1c4   : > { %v4129_v31 = vpop.f32.mrf.mxu0 }
 0x1c5   : > { %v5743_v14 = vpop.f32.mrf.mxu1 }
 0x1c6   : > { %v5745_v56 = vpop.f32.mrf.mxu0 }
 0x1c7   : > { %v4095_v7 = vpop.f32.mrf.mxu1 }
 0x1c8   : > { %v2264_v42 = vadd.f32 %v4095_v7, %v5642_v19  ;;  %v5748_v43 = vpop.f32.mrf.mxu0 }
 0x1c9   : > { %v5750_v11 = vpop.f32.mrf.mxu1 }
 0x1ca   : > { %v5752_v51 = vadd.f32 %v4129_v31, %v2264_v42  ;;  %v5754_v24 = vpop.f32.mrf.mxu0 }
 0x1cb   : > { %v5756_v50 = vpop.f32.mrf.mxu1 }
 0x1cc   : > { %v4133_v26 = vpop.f32.mrf.mxu0 }
 0x1cd   : > { %v5758_v47 = vpop.f32.mrf.mxu1 }
 0x1ce   : > { %v5760_v46 = vpop.f32.mrf.mxu0 }
 0x1cf   : > { %v4099_v29 = vpop.f32.mrf.mxu1 }
 0x1d0   : > { %v2268_v44 = vadd.f32 %v4099_v29, %v5654_v22  ;;  %v5763_v57 = vpop.f32.mrf.mxu0 }
 0x1d1   : > { %v5765_v19 = vpop.f32.mrf.mxu1 }
 0x1d2   : > { %v5767_v9 = vadd.f32 %v4133_v26, %v2268_v44  ;;  %v5769_v31 = vpop.f32.mrf.mxu0 }
 0x1d3   : > { %6171 = vst [vmem:[#allocation19_spill] sm:$0xff] %v5769_v31  ;;  %v5771_v7 = vpop.f32.mrf.mxu1 }
 0x1d4   : > { %v4137_v42 = vpop.f32.mrf.mxu0 }
 0x1d5   : > { %v5773_v61 = vpop.f32.mrf.mxu1 }
 0x1d6   : > { %v5775_v13 = vpop.f32.mrf.mxu0 }
 0x1d7   : > { %6172 = vst [vmem:[#allocation21_spill] sm:$0xff] %v5775_v13  ;;  %v4103_v6 = vpop.f32.mrf.mxu1 }
 0x1d8   : > { %v2272_v40 = vadd.f32 %v4103_v6, %v5666_v1  ;;  %v5778_v27 = vpop.f32.mrf.mxu0 }
 0x1d9   : > { %6173 = vst [vmem:[#allocation24_spill] sm:$0xff] %v5778_v27  ;;  %v5780_v22 = vpop.f32.mrf.mxu1 }
 0x1da   : > { %v5782_v29 = vadd.f32 %v4137_v42, %v2272_v40  ;;  %v5784_v26 = vpop.f32.mrf.mxu0 }
 0x1db   : > { %6175 = vst [vmem:[#allocation32_spill] sm:$0xff] %v5784_v26  ;;  %v5786_v44 = vpop.f32.mrf.mxu1 }
 0x1dc   : > { %6174 = vst [vmem:[#allocation29_spill] sm:$0xff] %v5782_v29  ;;  %v4141_v21 = vpop.f32.mrf.mxu0 }
 0x1dd   : > { %v5788_v12 = vpop.f32.mrf.mxu1 }
 0x1de   : > { %6176 = vst [vmem:[#allocation9_spill] sm:$0xff] %v5788_v12  ;;  %v5790_v0 = vpop.f32.mrf.mxu0 }
 0x1df   : > { %6177 = vst [vmem:[#allocation27_spill] sm:$0xff] %v5790_v0  ;;  %v4107_v52 = vpop.f32.mrf.mxu1 }
 0x1e0   : > { %v2276_v13 = vadd.f32 %v4107_v52, %v5678_v48  ;;  %v5793_v31 = vpop.f32.mrf.mxu0 }
 0x1e1   : > { %6178 = vst [vmem:[#allocation23_spill] sm:$0xff] %v5793_v31  ;;  %v5795_v1 = vpop.f32.mrf.mxu1 }
 0x1e2   : > { %6179 = vst [vmem:[#allocation25_spill] sm:$0xff] %v5795_v1  ;;  %v5797_v6 = vadd.f32 %v4141_v21, %v2276_v13  ;;  %v5799_v40 = vpop.f32.mrf.mxu0 }
 0x1e3   : > { %6181 = vst [vmem:[#allocation30_spill] sm:$0xff] %v5799_v40  ;;  %v5801_v42 = vpop.f32.mrf.mxu1 }
 0x1e4   : > { %6180 = vst [vmem:[#allocation28_spill] sm:$0xff] %v5797_v6  ;;  %6182 = vst [vmem:[#allocation15_spill] sm:$0xff] %v5801_v42  ;;  %v4145_v26 = vpop.f32.mrf.mxu0 }
 0x1e5   : > { %v5803_v29 = vpop.f32.mrf.mxu1 }
 0x1e6   : > { %6183 = vst [vmem:[#allocation10_spill] sm:$0xff] %v5803_v29  ;;  %v5805_v27 = vpop.f32.mrf.mxu0 }
 0x1e7   : > { %6184 = vst [vmem:[#allocation11_spill] sm:$0xff] %v5805_v27  ;;  %v4111_v0 = vpop.f32.mrf.mxu1  ;;  %v2253_v27 = vadd.f32 %v5709_v20, %v5612_v58 }
 0x1e8   : > { %v2280_v12 = vadd.f32 %v4111_v0, %v5690_v18  ;;  %v5808_v52 = vpop.f32.mrf.mxu0  ;;  %v2251_v0 = vadd.f32 %v5713_v30, %v5615_v4  ;;  %v2254_v4 = vadd.f32 %v5720_v10, %v5621_v5  ;;  %v2257_v30 = vadd.f32 %v5726_v34, %v5624_v45 }
 0x1e9   : > { %6185 = vst [vmem:[#allocation13_spill] sm:$0xff] %v5808_v52  ;;  %v5810_v48 = vpop.f32.mrf.mxu1 }
 0x1ea   : > { %6186 = vst [vmem:[#allocation33_spill] sm:$0xff] %v5810_v48  ;;  %v5812_v31 = vadd.f32 %v4145_v26, %v2280_v12  ;;  %v5814_v21 = vpop.f32.mrf.mxu0  ;;  %v2459_v12 = vadd.f32 %v5702_v59, %v2253_v27  ;;  %v2457_v58 = vadd.f32 %v5707_v2, %v2251_v0  ;;  %v2463_v5 = vadd.f32 %v5718_v62, %v2257_v30 }
 0x1eb   : > { %6188 = vst [vmem:[#allocation35_spill] sm:$0xff] %v5814_v21  ;;  %v5816_v13 = vpop.f32.mrf.mxu1 }
 0x1ec   : > { %6187 = vst [vmem:[#allocation34_spill] sm:$0xff] %v5812_v31  ;;  %6189 = vst [vmem:[#allocation36_spill] sm:$0xff] %v5816_v13  ;;  %v4185_v40 = vpop.f32.mrf.mxu0 }
 0x1ed   : > { %v5818_v6 = vpop.f32.mrf.mxu1 }
 0x1ee   : > { %6190 = vst [vmem:[#allocation37_spill] sm:$0xff] %v5818_v6  ;;  %v2769_v29 = vpop.f32.mrf.mxu0 }
 0x1ef   : > { %v4151_v42 = vpop.f32.mrf.mxu1 }
 0x1f0   : > { %v4186_v18 = vpop.f32.mrf.mxu0  ;;  %v2686_v26 = vadd.f32 %v4151_v42, %v5704_v54 }
 0x1f1   : > { %v2557_v52 = vpop.f32.mrf.mxu1 }
 0x1f2   : > { %v2684_v21 = vadd.f32 %v2557_v52, %v5711_v32  ;;  %v2772_v31 = vpop.f32.mrf.mxu0  ;;  %v2898_v1 = vadd.f32 %v4185_v40, %v2686_v26  ;;  %v2255_v32 = vadd.f32 %v5728_v3, %v5627_v8 }
 0x1f3   : > { %v4152_v6 = vpop.f32.mrf.mxu1 }
 0x1f4   : > { %v2687_v20 = vadd.f32 %v4152_v6, %v2459_v12  ;;  %v4189_v13 = vpop.f32.mrf.mxu0  ;;  %v2896_v27 = vadd.f32 %v2769_v29, %v2684_v21  ;;  %v2460_v12 = vadd.f32 %v5715_v55, %v2254_v4  ;;  %v2258_v55 = vadd.f32 %v5735_v41, %v5633_v60 }
 0x1f5   : > { %v2560_v48 = vpop.f32.mrf.mxu1  ;;  %v3128_v21 = vmul.f32 %v2898_v1, %v2898_v1 }
 0x1f6   : > { %v2899_v59 = vadd.f32 %v4186_v18, %v2687_v20  ;;  %v2685_v54 = vadd.f32 %v2560_v48, %v2457_v58  ;;  %v2785_v42 = vpop.f32.mrf.mxu0  ;;  %v3126_v34 = vmul.f32 %v2896_v27, %v2896_v27  ;;  %v2261_v20 = vadd.f32 %v5741_v23, %v5636_v33 }
 0x1f7   : > { %v4155_v52 = vpop.f32.mrf.mxu1 }
 0x1f8   : > { %v3669_v2 = vpack.c.bf16 %v2899_v59, %v2898_v1  ;;  %v2897_v6 = vadd.f32 %v2772_v31, %v2685_v54  ;;  %v4190_v0 = vpop.f32.mrf.mxu0  ;;  %v2690_v10 = vadd.f32 %v4155_v52, %v5722_v38  ;;  %v2461_v31 = vadd.f32 %v5724_v15, %v2255_v32 }
 0x1f9   : > { %v2573_v45 = vpop.f32.mrf.mxu1  ;;  %v3129_v4 = vmul.f32 %v2899_v59, %v2899_v59 }
 0x1fa   : > { %3741 = vst [vmem:[%s5841_s10 + $0x8] sm:$0xff] %v3669_v2   ;;  %v3664_v29 = vpack.c.bf16 %v2897_v6, %v2896_v27  ;;  %v3088_v40 = vadd.f32 %v2897_v6, %v2896_v27  ;;  %v3127_v8 = vmul.f32 %v2897_v6, %v2897_v6  ;;  %v2788_v3 = vpop.f32.mrf.mxu0  ;;  %v2688_v48 = vadd.f32 %v2573_v45, %v2460_v12 }
 0x1fb   : > { %v4156_v62 = vpop.f32.mrf.mxu1  ;;  %v2902_v30 = vadd.f32 %v4189_v13, %v2690_v10  ;;  %v2464_v2 = vadd.f32 %v5730_v35, %v2258_v55  ;;  %v2467_v10 = vadd.f32 %v5733_v39, %v2261_v20 }
 0x1fc   : > { %3665 = vst [vmem:[%s5841_s10] sm:$0xff] %v3664_v29   ;;  %v3089_v38 = vadd.f32 %v3088_v40, %v2898_v1  ;;  %v3158_v18 = vadd.f32 %v3127_v8, %v3126_v34  ;;  %v2691_v26 = vadd.f32 %v4156_v62, %v2463_v5  ;;  %v4193_v58 = vpop.f32.mrf.mxu0  ;;  %v2900_v27 = vadd.f32 %v2785_v42, %v2688_v48 }
 0x1fd   : > { %v2576_v54 = vpop.f32.mrf.mxu1  ;;  %v2259_v1 = vadd.f32 %v5743_v14, %v5639_v17  ;;  %v3132_v48 = vmul.f32 %v2902_v30, %v2902_v30 }
 0x1fe   : > { %v3159_v52 = vadd.f32 %v3158_v18, %v3128_v21  ;;  %v3090_v15 = vadd.f32 %v3089_v38, %v2899_v59  ;;  %v2903_v32 = vadd.f32 %v4190_v0, %v2691_v26  ;;  %v2689_v60 = vadd.f32 %v2576_v54, %v2461_v31  ;;  %v2801_v41 = vpop.f32.mrf.mxu0 }
 0x1ff   : > { %v4159_v6 = vpop.f32.mrf.mxu1  ;;  %v3130_v5 = vmul.f32 %v2900_v27, %v2900_v27  ;;  %v2465_v8 = vadd.f32 %v5739_v36, %v2259_v1  ;;  %v2262_v31 = vadd.f32 %v5750_v11, %v5645_v25 }
 0x200   : > { %v3091_v12 = vadd.f32 %v3090_v15, %v2900_v27  ;;  %v3160_v45 = vadd.f32 %v3159_v52, %v3129_v4  ;;  %v3679_v33 = vpack.c.bf16 %v2903_v32, %v2902_v30  ;;  %v4194_v23 = vpop.f32.mrf.mxu0  ;;  %v2901_v13 = vadd.f32 %v2788_v3, %v2689_v60 }
 0x201   : > { %v2589_v42 = vpop.f32.mrf.mxu1  ;;  %v2694_v0 = vadd.f32 %v4159_v6, %v5737_v16  ;;  %v2265_v3 = vadd.f32 %v5756_v50, %v5648_v37  ;;  %v3133_v36 = vmul.f32 %v2903_v32, %v2903_v32  ;;  %v2468_v11 = vadd.f32 %v5745_v56, %v2262_v31 }
 0x202   : > { %v3161_v59 = vadd.f32 %v3160_v45, %v3130_v5  ;;  %3743 = vst [vmem:[%s5841_s10 + $0x18] sm:$0xff] %v3679_v33   ;;  %v2692_v34 = vadd.f32 %v2589_v42, %v2464_v2  ;;  %v2804_v35 = vpop.f32.mrf.mxu0  ;;  %v3674_v29 = vpack.c.bf16 %v2901_v13, %v2900_v27  ;;  %v3092_v40 = vadd.f32 %v3091_v12, %v2901_v13 }
 0x203   : > { %v3131_v17 = vmul.f32 %v2901_v13, %v2901_v13  ;;  %v4160_v14 = vpop.f32.mrf.mxu1  ;;  %v2906_v18 = vadd.f32 %v4193_v58, %v2694_v0  ;;  %v2263_v37 = vadd.f32 %v5758_v47, %v5651_v28  ;;  %v2471_v15 = vadd.f32 %v5748_v43, %v2265_v3 }
 0x204   : > { %v2695_v39 = vadd.f32 %v4160_v14, %v2467_v10  ;;  %v4197_v55 = vpop.f32.mrf.mxu0  ;;  %3742 = vst [vmem:[%s5841_s10 + $0x10] sm:$0xff] %v3674_v29   ;;  %v3093_v62 = vadd.f32 %v3092_v40, %v2902_v30  ;;  %v2904_v21 = vadd.f32 %v2801_v41, %v2692_v34  ;;  %v2266_v43 = vadd.f32 %v5765_v19, %v5657_v63 }
 0x205   : > { %v3162_v16 = vadd.f32 %v3161_v59, %v3131_v17  ;;  %v2592_v38 = vpop.f32.mrf.mxu1  ;;  %v2469_v47 = vadd.f32 %v5754_v24, %v2263_v37  ;;  %v2269_v33 = vadd.f32 %v5771_v7, %v5660_v53  ;;  %v3136_v42 = vmul.f32 %v2906_v18, %v2906_v18 }
 0x206   : > { %v2907_v26 = vadd.f32 %v4194_v23, %v2695_v39  ;;  %v2693_v20 = vadd.f32 %v2592_v38, %v2465_v8  ;;  %v2817_v4 = vpop.f32.mrf.mxu0  ;;  %v3094_v54 = vadd.f32 %v3093_v62, %v2903_v32  ;;  %v3134_v58 = vmul.f32 %v2904_v21, %v2904_v21 }
 0x207   : > { %v3163_v27 = vadd.f32 %v3162_v16, %v3132_v48  ;;  %v4163_v25 = vpop.f32.mrf.mxu1  ;;  %v2472_v19 = vadd.f32 %v5760_v46, %v2266_v43  ;;  %v2267_v53 = vadd.f32 %v5773_v61, %v5663_v49  ;;  %v2475_v3 = vadd.f32 %v5763_v57, %v2269_v33  ;;  %v6191_v61 = vld [vmem:[#allocation19_spill] sm:$0xff]  ;;  %v6197_v43 = vld [vmem:[#allocation24_spill] sm:$0xff] }
 0x208   : > { %v3689_v50 = vpack.c.bf16 %v2907_v26, %v2906_v18  ;;  %v2905_v52 = vadd.f32 %v2804_v35, %v2693_v20  ;;  %v4198_v30 = vpop.f32.mrf.mxu0  ;;  %v3095_v60 = vadd.f32 %v3094_v54, %v2904_v21  ;;  %v2698_v32 = vadd.f32 %v4163_v25, %v5752_v51 }
 0x209   : > { %v3164_v41 = vadd.f32 %v3163_v27, %v3133_v36  ;;  %v2605_v2 = vpop.f32.mrf.mxu1  ;;  %v3137_v24 = vmul.f32 %v2907_v26, %v2907_v26  ;;  %v6192_v36 = vld [vmem:[#allocation16_spill] sm:$0xff]  ;;  %v6193_v27 = vld [vmem:[#allocation14_spill] sm:$0xff] }
 0x20a   : > { %3745 = vst [vmem:[%s5841_s10 + $0x28] sm:$0xff] %v3689_v50   ;;  %v3684_v1 = vpack.c.bf16 %v2905_v52, %v2904_v21  ;;  %v3135_v6 = vmul.f32 %v2905_v52, %v2905_v52  ;;  %v2696_v12 = vadd.f32 %v2605_v2, %v2468_v11  ;;  %v2820_v56 = vpop.f32.mrf.mxu0  ;;  %v3096_v45 = vadd.f32 %v3095_v60, %v2905_v52 }
 0x20b   : > { %v3165_v5 = vadd.f32 %v3164_v41, %v3134_v58  ;;  %v4164_v28 = vpop.f32.mrf.mxu1  ;;  %v2910_v34 = vadd.f32 %v4197_v55, %v2698_v32  ;;  %v2270_v57 = vadd.f32 %v5780_v22, %v6192_v36  ;;  %v2273_v54 = vadd.f32 %v5786_v44, %v6193_v27  ;;  %v6194_v32 = vld [vmem:[#allocation21_spill] sm:$0xff]  ;;  %v6195_v44 = vld [vmem:[#allocation18_spill] sm:$0xff] }
 0x20c   : > { %3744 = vst [vmem:[%s5841_s10 + $0x20] sm:$0xff] %v3684_v1   ;;  %v2699_v23 = vadd.f32 %v4164_v28, %v2471_v15  ;;  %v4201_v13 = vpop.f32.mrf.mxu0  ;;  %v3097_v10 = vadd.f32 %v3096_v45, %v2906_v18  ;;  %v2908_v51 = vadd.f32 %v2817_v4, %v2696_v12  ;;  %v2473_v4 = vadd.f32 %v6191_v61, %v2267_v53  ;;  %v6201_v53 = vld [vmem:[#allocation25_spill] sm:$0xff] }
 0x20d   : > { %v3166_v59 = vadd.f32 %v3165_v5, %v3135_v6  ;;  %v2608_v0 = vpop.f32.mrf.mxu1  ;;  %v3140_v37 = vmul.f32 %v2910_v34, %v2910_v34  ;;  %v2476_v12 = vadd.f32 %v6194_v32, %v2270_v57  ;;  %v2479_v33 = vadd.f32 %v6197_v43, %v2273_v54  ;;  %v6204_v57 = vld [vmem:[#allocation27_spill] sm:$0xff]  ;;  %v6205_v54 = vld [vmem:[#allocation26_spill] sm:$0xff]  ;;  %v6211_v43 = vld [vmem:[#allocation33_spill] sm:$0xff] }
 0x20e   : > { %v2911_v35 = vadd.f32 %v4198_v30, %v2699_v23  ;;  %v2697_v29 = vadd.f32 %v2608_v0, %v2469_v47  ;;  %v2833_v40 = vpop.f32.mrf.mxu0  ;;  %v3098_v14 = vadd.f32 %v3097_v10, %v2907_v26  ;;  %v3138_v55 = vmul.f32 %v2908_v51, %v2908_v51  ;;  %v6198_v0 = vld [vmem:[#allocation29_spill] sm:$0xff] }
 0x20f   : > { %v3167_v17 = vadd.f32 %v3166_v59, %v3136_v42  ;;  %v4167_v63 = vpop.f32.mrf.mxu1 }
 0x210   : > { %v3699_v7 = vpack.c.bf16 %v2911_v35, %v2910_v34  ;;  %v2909_v8 = vadd.f32 %v2820_v56, %v2697_v29  ;;  %v4202_v31 = vpop.f32.mrf.mxu0  ;;  %v3099_v39 = vadd.f32 %v3098_v14, %v2908_v51  ;;  %v2702_v38 = vadd.f32 %v4167_v63, %v5767_v9  ;;  %v6196_v56 = vld [vmem:[#allocation9_spill] sm:$0xff]  ;;  %v6199_v14 = vld [vmem:[#allocation32_spill] sm:$0xff] }
 0x211   : > { %v3168_v48 = vadd.f32 %v3167_v17, %v3137_v24  ;;  %v2621_v62 = vpop.f32.mrf.mxu1  ;;  %v3141_v2 = vmul.f32 %v2911_v35, %v2911_v35  ;;  %v2271_v5 = vadd.f32 %v6196_v56, %v6195_v44 }
 0x212   : > { %3747 = vst [vmem:[%s5841_s10 + $0x38] sm:$0xff] %v3699_v7   ;;  %v3694_v16 = vpack.c.bf16 %v2909_v8, %v2908_v51  ;;  %v3139_v21 = vmul.f32 %v2909_v8, %v2909_v8  ;;  %v2700_v18 = vadd.f32 %v2621_v62, %v2472_v19  ;;  %v2836_v46 = vpop.f32.mrf.mxu0  ;;  %v3100_v20 = vadd.f32 %v3099_v39, %v2909_v8  ;;  %v6200_v19 = vld [vmem:[#allocation20_spill] sm:$0xff]  ;;  %v6202_v8 = vld [vmem:[#allocation22_spill] sm:$0xff] }
 0x213   : > { %v3169_v26 = vadd.f32 %v3168_v48, %v3138_v55  ;;  %v4168_v49 = vpop.f32.mrf.mxu1  ;;  %v2914_v15 = vadd.f32 %v4201_v13, %v2702_v38  ;;  %v2477_v63 = vadd.f32 %v6199_v14, %v2271_v5  ;;  %v2274_v7 = vadd.f32 %v6201_v53, %v6200_v19 }
 0x214   : > { %3746 = vst [vmem:[%s5841_s10 + $0x30] sm:$0xff] %v3694_v16   ;;  %v2703_v25 = vadd.f32 %v4168_v49, %v2475_v3  ;;  %v4205_v11 = vpop.f32.mrf.mxu0  ;;  %v3101_v50 = vadd.f32 %v3100_v20, %v2910_v34  ;;  %v2912_v9 = vadd.f32 %v2833_v40, %v2700_v18 }
 0x215   : > { %v3170_v52 = vadd.f32 %v3169_v26, %v3139_v21  ;;  %v2624_v30 = vpop.f32.mrf.mxu1  ;;  %v3144_v48 = vmul.f32 %v2914_v15, %v2914_v15  ;;  %v2480_v27 = vadd.f32 %v6204_v57, %v2274_v7 }
 0x216   : > { %v2915_v60 = vadd.f32 %v4202_v31, %v2703_v25  ;;  %v2701_v58 = vadd.f32 %v2624_v30, %v2473_v4  ;;  %v2849_v41 = vpop.f32.mrf.mxu0  ;;  %v3102_v6 = vadd.f32 %v3101_v50, %v2911_v35  ;;  %v3142_v13 = vmul.f32 %v2912_v9, %v2912_v9  ;;  %v6203_v31 = vld [vmem:[#allocation15_spill] sm:$0xff]  ;;  %v6206_v25 = vld [vmem:[#allocation10_spill] sm:$0xff] }
 0x217   : > { %v3171_v1 = vadd.f32 %v3170_v52, %v3140_v37  ;;  %v4171_v22 = vpop.f32.mrf.mxu1  ;;  %v2277_v3 = vadd.f32 %v6203_v31, %v6202_v8  ;;  %v2275_v37 = vadd.f32 %v6206_v25, %v6205_v54  ;;  %v6207_v30 = vld [vmem:[#allocation23_spill] sm:$0xff] }
 0x218   : > { %v3709_v45 = vpack.c.bf16 %v2915_v60, %v2914_v15  ;;  %v2913_v28 = vadd.f32 %v2836_v46, %v2701_v58  ;;  %v4206_v47 = vpop.f32.mrf.mxu0  ;;  %v3103_v23 = vadd.f32 %v3102_v6, %v2912_v9  ;;  %v2706_v34 = vadd.f32 %v4171_v22, %v6198_v0  ;;  %v6214_v8 = vld [vmem:[#allocation11_spill] sm:$0xff] }
 0x219   : > { %v3172_v42 = vadd.f32 %v3171_v1, %v3141_v2  ;;  %v2637_v10 = vpop.f32.mrf.mxu1  ;;  %v3145_v49 = vmul.f32 %v2915_v60, %v2915_v60 }
 0x21a   : > { %3749 = vst [vmem:[%s5841_s10 + $0x48] sm:$0xff] %v3709_v45   ;;  %v3704_v59 = vpack.c.bf16 %v2913_v28, %v2912_v9  ;;  %v3143_v51 = vmul.f32 %v2913_v28, %v2913_v28  ;;  %v2704_v35 = vadd.f32 %v2637_v10, %v2476_v12  ;;  %v2852_v29 = vpop.f32.mrf.mxu0  ;;  %v3104_v24 = vadd.f32 %v3103_v23, %v2913_v28  ;;  %v6209_v45 = vld [vmem:[#allocation30_spill] sm:$0xff]  ;;  %v6212_v23 = vld [vmem:[#allocation12_spill] sm:$0xff] }
 0x21b   : > { %v3173_v40 = vadd.f32 %v3172_v42, %v3142_v13  ;;  %v4172_v17 = vpop.f32.mrf.mxu1  ;;  %v2918_v18 = vadd.f32 %v4205_v11, %v2706_v34  ;;  %v2481_v28 = vadd.f32 %v6209_v45, %v2275_v37  ;;  %v6213_v13 = vld [vmem:[#allocation36_spill] sm:$0xff]  ;;  %v6219_v37 = vld [vmem:[#allocation35_spill] sm:$0xff] }
 0x21c   : > { %3748 = vst [vmem:[%s5841_s10 + $0x40] sm:$0xff] %v3704_v59   ;;  %v2707_v39 = vadd.f32 %v4172_v17, %v2479_v33  ;;  %v4209_v55 = vpop.f32.mrf.mxu0  ;;  %v3105_v62 = vadd.f32 %v3104_v24, %v2914_v15  ;;  %v2916_v21 = vadd.f32 %v2849_v41, %v2704_v35  ;;  %v2483_v15 = vadd.f32 %v6207_v30, %v2277_v3  ;;  %v6215_v3 = vld [vmem:[#allocation17_spill] sm:$0xff] }
 0x21d   : > { %v3174_v16 = vadd.f32 %v3173_v40, %v3143_v51  ;;  %v2640_v38 = vpop.f32.mrf.mxu1  ;;  %v2281_v42 = vadd.f32 %v6213_v13, %v6212_v23  ;;  %v3148_v51 = vmul.f32 %v2918_v18, %v2918_v18 }
 0x21e   : > { %v2919_v46 = vadd.f32 %v4206_v47, %v2707_v39  ;;  %v2705_v26 = vadd.f32 %v2640_v38, %v2477_v63  ;;  %v2865_v20 = vpop.f32.mrf.mxu0  ;;  %v3106_v4 = vadd.f32 %v3105_v62, %v2915_v60  ;;  %v3146_v11 = vmul.f32 %v2916_v21, %v2916_v21  ;;  %v6208_v60 = vld [vmem:[#allocation28_spill] sm:$0xff]  ;;  %v6210_v47 = vld [vmem:[#allocation31_spill] sm:$0xff]  ;;  %v6216_v39 = vld [vmem:[#allocation37_spill] sm:$0xff] }
 0x21f   : > { %v3175_v61 = vadd.f32 %v3174_v16, %v3144_v48  ;;  %v4175_v36 = vpop.f32.mrf.mxu1  ;;  %v2278_v33 = vadd.f32 %v6211_v43, %v6210_v47  ;;  %v2279_v48 = vadd.f32 %v6216_v39, %v6215_v3 }
 0x220   : > { %v3719_v50 = vpack.c.bf16 %v2919_v46, %v2918_v18  ;;  %v2917_v52 = vadd.f32 %v2852_v29, %v2705_v26  ;;  %v4210_v9 = vpop.f32.mrf.mxu0  ;;  %v3107_v58 = vadd.f32 %v3106_v4, %v2916_v21  ;;  %v2710_v22 = vadd.f32 %v4175_v36, %v6208_v60 }
 0x221   : > { %v3176_v41 = vadd.f32 %v3175_v61, %v3145_v49  ;;  %v2653_v2 = vpop.f32.mrf.mxu1  ;;  %v3149_v14 = vmul.f32 %v2919_v46, %v2919_v46  ;;  %v2484_v31 = vadd.f32 %v6214_v8, %v2278_v33 }
 0x222   : > { %3751 = vst [vmem:[%s5841_s10 + $0x58] sm:$0xff] %v3719_v50   ;;  %v3714_v1 = vpack.c.bf16 %v2917_v52, %v2916_v21  ;;  %v3147_v6 = vmul.f32 %v2917_v52, %v2917_v52  ;;  %v2708_v32 = vadd.f32 %v2653_v2, %v2480_v27  ;;  %v2868_v12 = vpop.f32.mrf.mxu0  ;;  %v3108_v56 = vadd.f32 %v3107_v58, %v2917_v52  ;;  %v6217_v21 = vld [vmem:[#allocation13_spill] sm:$0xff] }
 0x223   : > { %v3177_v44 = vadd.f32 %v3176_v41, %v3146_v11  ;;  %v4176_v5 = vpop.f32.mrf.mxu1  ;;  %v2922_v40 = vadd.f32 %v4209_v55, %v2710_v22  ;;  %v2487_v38 = vadd.f32 %v6217_v21, %v2281_v42  ;;  %v2485_v50 = vadd.f32 %v6219_v37, %v2279_v48 }
 0x224   : > { %3750 = vst [vmem:[%s5841_s10 + $0x50] sm:$0xff] %v3714_v1   ;;  %v2711_v10 = vadd.f32 %v4176_v5, %v2483_v15  ;;  %v4213_v59 = vpop.f32.mrf.mxu0  ;;  %v3109_v0 = vadd.f32 %v3108_v56, %v2918_v18  ;;  %v2920_v35 = vadd.f32 %v2865_v20, %v2708_v32 }
 0x225   : > { %v3178_v34 = vadd.f32 %v3177_v44, %v3147_v6  ;;  %v2656_v29 = vpop.f32.mrf.mxu1 }
 0x226   : > { %v2923_v24 = vadd.f32 %v4210_v9, %v2711_v10  ;;  %v2709_v17 = vadd.f32 %v2656_v29, %v2481_v28  ;;  %v3110_v19 = vadd.f32 %v3109_v0, %v2919_v46  ;;  %v2881_v7 = vpop.f32.mrf.mxu0  ;;  %v3150_v55 = vmul.f32 %v2920_v35, %v2920_v35  ;;  %v6218_v46 = vld [vmem:[#allocation34_spill] sm:$0xff] }
 0x227   : > { %v3179_v63 = vadd.f32 %v3178_v34, %v3148_v51  ;;  %v4179_v53 = vpop.f32.mrf.mxu1  ;;  %v3152_v9 = vmul.f32 %v2922_v40, %v2922_v40 }
 0x228   : > { %v3729_v62 = vpack.c.bf16 %v2923_v24, %v2922_v40  ;;  %v2921_v16 = vadd.f32 %v2868_v12, %v2709_v17  ;;  %v3111_v18 = vadd.f32 %v3110_v19, %v2920_v35  ;;  %v2714_v4 = vadd.f32 %v4179_v53, %v6218_v46  ;;  %v4214_v25 = vpop.f32.mrf.mxu0 }
 0x229   : > { %v3180_v26 = vadd.f32 %v3179_v63, %v3149_v14  ;;  %v2669_v20 = vpop.f32.mrf.mxu1  ;;  %v3153_v6 = vmul.f32 %v2923_v24, %v2923_v24 }
 0x22a   : > { %3753 = vst [vmem:[%s5841_s10 + $0x68] sm:$0xff] %v3729_v62   ;;  %v3724_v49 = vpack.c.bf16 %v2921_v16, %v2920_v35  ;;  %v3151_v61 = vmul.f32 %v2921_v16, %v2921_v16  ;;  %v2712_v36 = vadd.f32 %v2669_v20, %v2484_v31  ;;  %v3112_v27 = vadd.f32 %v3111_v18, %v2921_v16  ;;  %v2884_v32 = vpop.f32.mrf.mxu0 }
 0x22b   : > { %v3181_v57 = vadd.f32 %v3180_v26, %v3150_v55  ;;  %v4180_v54 = vpop.f32.mrf.mxu1  ;;  %v2926_v41 = vadd.f32 %v4213_v59, %v2714_v4 }
 0x22c   : > { %3752 = vst [vmem:[%s5841_s10 + $0x60] sm:$0xff] %v3724_v49   ;;  %v2715_v52 = vadd.f32 %v4180_v54, %v2487_v38  ;;  %v3113_v30 = vadd.f32 %v3112_v27, %v2922_v40  ;;  %v2924_v58 = vadd.f32 %v2881_v7, %v2712_v36 }
 0x22d   : > { %v3182_v15 = vadd.f32 %v3181_v57, %v3151_v61  ;;  %v2672_v11 = vpop.f32.mrf.mxu1  ;;  %v3156_v23 = vmul.f32 %v2926_v41, %v2926_v41 }
 0x22e   : > { %v2927_v2 = vadd.f32 %v4214_v25, %v2715_v52  ;;  %v2713_v1 = vadd.f32 %v2672_v11, %v2485_v50  ;;  %v3114_v22 = vadd.f32 %v3113_v30, %v2923_v24  ;;  %v3154_v5 = vmul.f32 %v2924_v58, %v2924_v58 }
 0x22f   : > { %v3183_v60 = vadd.f32 %v3182_v15, %v3152_v9 }
 0x230   : > { %v3739_v12 = vpack.c.bf16 %v2927_v2, %v2926_v41  ;;  %v2925_v44 = vadd.f32 %v2884_v32, %v2713_v1  ;;  %v3115_v56 = vadd.f32 %v3114_v22, %v2924_v58 }
 0x231   : > { %v3184_v45 = vadd.f32 %v3183_v60, %v3153_v6 }
 0x232   : > { %3755 = vst [vmem:[%s5841_s10 + $0x78] sm:$0xff] %v3739_v12   ;;  %v3734_v28 = vpack.c.bf16 %v2925_v44, %v2924_v58  ;;  %v3155_v47 = vmul.f32 %v2925_v44, %v2925_v44  ;;  %v3116_v33 = vadd.f32 %v3115_v56, %v2925_v44 }
 0x233   : > { %v3185_v43 = vadd.f32 %v3184_v45, %v3154_v5 }
 0x234   : > { %3754 = vst [vmem:[%s5841_s10 + $0x70] sm:$0xff] %v3734_v28   ;;  %v3117_v13 = vadd.f32 %v3116_v33, %v2926_v41 }
 0x235   : > { %v3186_v42 = vadd.f32 %v3185_v43, %v3155_v47 }
 0x236   : > { %4310 = shalt.err (!%p4307_p3)
}
 0x237   : > { %s4311_s5 = scalar_lea.hbm %s5923_s22, 2048  ;;  %s4315_s9 = scalar_lea.hbm %s6039_s2, 4096 }
 0x238   : > { %p4312_p4 = scmp.ne.s32.totalorder %s5923_s22, %s4311_s5  ;;  %p4316_p9 = scmp.lt.s32.totalorder %s5923_s22, %s6039_s2 }
 0x239   : > { %p4317_p10 = scmp.lt.s32.totalorder %s4315_s9, %s4311_s5 }
 0x23a   : > { %p4313_p7 = pnand %p4312_p4, %p4485_p5 }
 0x23b   : > { %p4318_p11 = por %p4317_p10, %p4316_p9 }
 0x23c   : > { %p4314_p8 = pneg %p4313_p7 }
 0x23e   : > { %p4319_p12 = pnand %p4318_p11, %p4314_p8 }
 0x240   : > { %4322 = shalt.err (!%p4319_p12)
}
 0x241   : > { %s4416_s13 = smov 64   ;;  %s4417_s14 = smov 4   ;;  %v3157_v10 = vmul.f32 %v2927_v2, %v2927_v2  ;;  %v3118_v59 = vadd.f32 %v3117_v13, %v2927_v2  ;;  %v3187_v51 = vadd.f32 %v3186_v42, %v3156_v23 }
 0x242   : > { %4228 = dma.vmem_to_hbm [thread:$0]  (%p4485_p5), %s5925_s12, 2048, %s5923_s22, %s3197_s23, %s4416_s13, %s4416_s13, %s4417_s14  }
 0x243   : > { %v3119_v0 = vrot.slane %v3118_v59, 4  ;;  %v3188_v34 = vadd.f32 %v3187_v51, %v3157_v10  ;;  %s3201_s27 = sand.u32 1, %s4466_s19   ;;  %s3624_s28 = sshll.u32 %s4466_s19, 4 }
 0x244   : > { %s200_s29 = scalar_lea.vmem [#allocation4], %s5825_s8  ;;  %s206_s12 = scalar_lea.vmem [#allocation6], %s5825_s8 }
 0x245   : > { %v3189_v35 = vrot.slane %v3188_v34, 4  ;;  %v3120_v29 = vadd.f32 %v3119_v0, %v3118_v59  ;;  %s3234_s30 = sshll.u32 %s200_s29, 4  ;;  %s3247_s22 = sshll.u32 %s206_s12, 4  ;;  %s5963_s30 = int_to_ptr.vmem [resolvable:$true] %s3234_s30  ;;  %s5970_s22 = int_to_ptr.vmem [resolvable:$true] %s3247_s22 }
 0x246   : > { %s5961_s6 = scalar_lea.hbm %s6040_s3, %s3624_s28  ;;  %s5968_s9 = scalar_lea.hbm %s6041_s4, %s3624_s28 }
 0x247   : > { %v3121_v40 = vrot.slane %v3120_v29, 2  ;;  %v3190_v24 = vadd.f32 %v3189_v35, %v3188_v34  ;;  %s5972_s10 = scalar_lea.sflag [#allocation5], %s3201_s27  ;;  %s4323_s11 = scalar_lea.vmem %s5963_s30, 16 }
 0x248   : > { %p4324_p13 = scmp.ne.s32.totalorder %s5963_s30, %s4323_s11  ;;  %s4418_s13 = smov [#allocation4]  }
 0x249   : > { %v3122_v17 = vadd.f32 %v3121_v40, %v3120_v29  ;;  %v3191_v14 = vrot.slane %v3190_v24, 2  ;;  %s4327_s14 = sshll.u32 %s4418_s13, 4  ;;  %s4328_s14 = int_to_ptr.vmem [resolvable:$false] %s4327_s14 }
 0x24a   : > { %p4325_p0 = pnand %p4324_p13, %p4485_p5  ;;  %s4329_s23 = scalar_lea.vmem %s4328_s14, 32 }
 0x24b   : > { %v3123_v63 = vrot.slane %v3122_v17, 1  ;;  %v3192_v19 = vadd.f32 %v3191_v14, %v3190_v24  ;;  %p4330_p2 = scmp.lt.s32.totalorder %s5963_s30, %s4328_s14  ;;  %p4331_p3 = scmp.lt.s32.totalorder %s4329_s23, %s4323_s11 }
 0x24c   : > { %p4326_p1 = pneg %p4325_p0 }
 0x24d   : > { %v3124_v53 = vadd.f32 %v3123_v63, %v3122_v17  ;;  %v3193_v7 = vrot.slane %v3192_v19, 1  ;;  %p4332_p4 = por %p4331_p3, %p4330_p2 }
 0x24f   : > { %3125 = vst [vmem:[%s200_s29] sm:$0x1] %v3124_v53  ;;  %v3194_v8 = vadd.f32 %v3193_v7, %v3192_v19  ;;  %p4333_p7 = pnand %p4332_p4, %p4326_p1 }
 0x251   : > { %4336 = shalt.err (!%p4333_p7)
}
 0x252   : > { %s4337_s27 = scalar_lea.hbm %s5961_s6, 16  ;;  %s4341_s5 = scalar_lea.hbm %s6040_s3, 32 }
 0x253   : > { %p4338_p8 = scmp.ne.s32.totalorder %s5961_s6, %s4337_s27  ;;  %p4342_p11 = scmp.lt.s32.totalorder %s5961_s6, %s6040_s3 }
 0x254   : > { %p4343_p12 = scmp.lt.s32.totalorder %s4341_s5, %s4337_s27 }
 0x255   : > { %p4339_p9 = pnand %p4338_p8, %p4485_p5 }
 0x256   : > { %p4344_p13 = por %p4343_p12, %p4342_p11 }
 0x257   : > { %p4340_p10 = pneg %p4339_p9 }
 0x259   : > { %p4345_p0 = pnand %p4344_p13, %p4340_p10 }
 0x25b   : > { %4348 = shalt.err (!%p4345_p0)
}
 0x25c   : > { %4229 = dma.vmem_to_hbm [thread:$0]  (%p4485_p5), %s5963_s30, 16, %s5961_s6, %s5972_s10   ;;  %3195 = vst [vmem:[%s206_s12] sm:$0x1] %v3194_v8 }
 0x25d   : > { %s4349_s11 = scalar_lea.vmem %s5970_s22, 16  ;;  %s4419_s13 = smov [#allocation6]  }
 0x25e   : > { %p4350_p1 = scmp.ne.s32.totalorder %s5970_s22, %s4349_s11  ;;  %s4353_s14 = sshll.u32 %s4419_s13, 4  ;;  %s4354_s14 = int_to_ptr.vmem [resolvable:$false] %s4353_s14 }
 0x25f   : > { %s4355_s23 = scalar_lea.vmem %s4354_s14, 32  ;;  %p4356_p4 = scmp.lt.s32.totalorder %s5970_s22, %s4354_s14 }
 0x260   : > { %p4351_p2 = pnand %p4350_p1, %p4485_p5  ;;  %p4357_p7 = scmp.lt.s32.totalorder %s4355_s23, %s4349_s11 }
 0x262   : > { %p4352_p3 = pneg %p4351_p2  ;;  %p4358_p8 = por %p4357_p7, %p4356_p4 }
 0x264   : > { %p4359_p9 = pnand %p4358_p8, %p4352_p3 }
 0x266   : > { %4362 = shalt.err (!%p4359_p9)
}
 0x267   : > { %s4363_s8 = scalar_lea.hbm %s5968_s9, 16  ;;  %s4367_s6 = scalar_lea.hbm %s6041_s4, 32 }
 0x268   : > { %p4364_p10 = scmp.ne.s32.totalorder %s5968_s9, %s4363_s8  ;;  %p4368_p13 = scmp.lt.s32.totalorder %s5968_s9, %s6041_s4 }
 0x269   : > { %p4369_p0 = scmp.lt.s32.totalorder %s4367_s6, %s4363_s8 }
 0x26a   : > { %p4365_p11 = pnand %p4364_p10, %p4485_p5 }
 0x26b   : > { %p4370_p1 = por %p4369_p0, %p4368_p13 }
 0x26c   : > { %p4366_p12 = pneg %p4365_p11 }
 0x26e   : > { %p4371_p2 = pnand %p4370_p1, %p4366_p12 }
 0x270   : > { %4374 = shalt.err (!%p4371_p2)
}
 0x271   : > { %4230 = dma.vmem_to_hbm [thread:$0]  (%p4485_p5), %s5970_s22, 16, %s5968_s9, %s5972_s10  }
 0x272 PF: > { %p4244_p3 = scmp.ge.s32.totalorder %s4413_s18, 2  ;;  %s3259_s29 = sand.u32 1, %s4401_s15  }
 0x273   : > { %s3260_s5 = scalar_lea.sflag [#allocation3], %s3259_s29 }
 0x274   : > { %p4235_p4 = pnand %p4244_p3, %p4489_p6 }
 0x276   : > { %p4236_p7 = pneg %p4235_p4 }
 0x278   : > { %4392 = dma.done.wait (%p4236_p7), %s3260_s5, 2048  }
 0x279   : > { %4394 = vsyncadd (%p4236_p7), %s3260_s5, 4294965248  ;;  %s3268_s19 = sand.u32 1, %s3359_s20  }
 0x27a   : > { %s3269_s25 = scalar_lea.sflag [#allocation5], %s3268_s19 }
 0x27b   : > { %4396 = dma.done.wait (%p4236_p7), %s3269_s25, 32  }
 0x27c   : > { %4398 = vsyncadd (%p4236_p7), %s3269_s25, 4294967264  ;;  %p18_p5 = scmp.ge.s32.totalorder %s4470_s21, 4   ;;  %s6220_s15 = smov %s4405_s16 }
 0x27d   : > { %s6221_s16 = smov %s4409_s17  ;;  %s6222_s17 = smov %s4483_s24 }
 0x27e   : > { %s6223_s18 = smov %s4470_s21  ;;  %20 = sbr.rel (!%p18_p5) target bundleno = 5 (0x5), region = 103 }
 0x283   :  { %3281 = vsyncpa [#allocation3], 1 }
 0x284   :  { %3283 = vsyncpa [#allocation3 + $0x1], 1 }
 0x285   :  { %3284 = vsyncpa [#allocation5], 1 }
 0x286   :  { %3286 = vsyncpa [#allocation5 + $0x1], 1 }

</bundles_post_ra>
